<compile_context>
chip_gen: v7x
topology: tpu7x:2x2x1
jax: 0.10.0
libtpu: 0.0.40
codegen_flags: <defaults>
</compile_context>

<pallas_src>
import jax
import jax.numpy as jnp
import numpy as np
from jax import lax
from jax.experimental import pallas as pl
from jax.experimental.pallas import tpu as pltpu

C_IN = 3
C_OUT = 3
KH = 100
KW = 100


# ----------------------------------------------------------------------------
# Pallas kernel: degenerate-weight valid conv for one image, fully aligned.
# ----------------------------------------------------------------------------
def _degenerate_conv_kernel(xsh_ref, ws_ref, o_ref):
    """xsh_ref: (1, OW, H, LW) channel-summed image, one lane-shifted copy per
                output column, zero-padded to LW (multiple of 128) lanes.
    ws_ref:  (OH, H, LW) base filter, one sublane-shifted zero-padded copy per
                output row (constant block, fetched once across the grid).
    o_ref:   (1, OH, OW) per-image single-channel output tile.
    """
    n_oh = o_ref.shape[1]
    n_ow = o_ref.shape[2]
    oh_ids = lax.broadcasted_iota(jnp.int32, (n_oh, n_ow), 0)
    ow_ids = lax.broadcasted_iota(jnp.int32, (n_oh, n_ow), 1)
    res = jnp.zeros((n_oh, n_ow), jnp.float32)

    # OH*OW is small and static (5x5 at the test shape) -> Python-unrolled.
    for ow in range(n_ow):
        a = xsh_ref[0, ow]                      # (H, LW): aligned full block (13 vregs)
        for oh in range(n_oh):
            # Full-block VPU multiply + tree reduce; the zero padding baked
            # into ws_ref[oh] implements the (kh, kw) window and lane mask.
            s = jnp.sum(a * ws_ref[oh])         # weight slab loaded in-loop (no hoist)
            res = jnp.where((oh_ids == oh) & (ow_ids == ow), s, res)

    o_ref[0] = res                              # single store per image


def _pallas_conv2d_degenerate(x, w_base):
    """x: (N, C_in, H, W) f32, w_base: (KH, KW) filter shared by all (o, i) ->
    (N, OH, OW) f32 single-channel result (identical for every output channel
    of the torch module; bias NOT included)."""
    n, _, h, w = x.shape
    kh, kw = w_base.shape
    n_oh, n_ow = h - kh + 1, w - kw + 1
    lw = pl.cdiv(kw, 128) * 128                 # lane-aligned window width

    # ---- wrapper-side prep (cheap XLA layout plumbing) ----------------------
    # (1) channel degeneracy: weight[o][i] is identical, so sum x over C_in.
    xs = jnp.sum(x, axis=1)                                       # (N, H, W)
    # (2) lane-pad and materialize the OW lane-shifted copies so the kernel
    #     only touches full (8,128)-aligned blocks (no in-kernel unaligned
    #     slices / rolls / relayouts).
    xs = jnp.pad(xs, ((0, 0), (0, 0), (0, (n_ow - 1) + lw - w)))
    xsh = jnp.stack([xs[:, :, j:j + lw] for j in range(n_ow)], axis=1)  # (N, OW, H, LW)
    # (3) OH sublane-shifted, zero-padded copies of the base filter: row r of
    #     ws[oh] holds w_base[r - oh] for oh <= r < oh + KH, zeros elsewhere,
    #     realizing both the kh window and the kw < KW lane mask.
    ws = jnp.stack(
        [jnp.pad(w_base, ((j, h - kh - j), (0, lw - kw))) for j in range(n_oh)],
        axis=0)                                                   # (OH, H, LW)

    return pl.pallas_call(
        _degenerate_conv_kernel,
        out_shape=jax.ShapeDtypeStruct((n, n_oh, n_ow), jnp.float32),
        grid_spec=pltpu.PrefetchScalarGridSpec(
            num_scalar_prefetch=0,
            grid=(n,),                          # one image per step
            in_specs=[
                # Shifted image stack for this image (~266 KB, double-buffered).
                pl.BlockSpec((1, n_ow, h, lw), lambda i: (i, 0, 0, 0)),
                # Pre-shifted filter stack, constant block -> fetched once.
                pl.BlockSpec((n_oh, h, lw), lambda i: (0, 0, 0)),
            ],
            out_specs=pl.BlockSpec((1, n_oh, n_ow), lambda i: (i, 0, 0)),
        ),
        compiler_params=pltpu.CompilerParams(
            dimension_semantics=("parallel",),  # images independent (v7x 2 TCs)
            vmem_limit_bytes=8 << 20,           # ~1 MiB used; ample headroom
        ),
    )(xsh, ws)


# ----------------------------------------------------------------------------
# Parameters replicating the torch module's __init__.
# ----------------------------------------------------------------------------
def make_synthetic_params():
    # weight[0][0][i][j] = i*100 + j; every other (o, i) slice copies it, so a
    # single (KH, KW) base filter captures the whole weight tensor.
    base = (
        jnp.arange(KH, dtype=jnp.float32)[:, None] * 100.0
        + jnp.arange(KW, dtype=jnp.float32)[None, :]
    )                                                   # (KH, KW)

    # TODO(synk): torch's default Conv2d bias init draws from torch's RNG
    # stream; this is a deterministic U(-1/sqrt(fan_in), 1/sqrt(fan_in)) stand-in.
    fan_in = C_IN * KH * KW
    bound = 1.0 / np.sqrt(fan_in)
    bias = jax.random.uniform(
        jax.random.PRNGKey(42), (C_OUT,), jnp.float32, minval=-bound, maxval=bound
    )
    return base, bias


@jax.jit
def single_conv2d_forward(x, w_base, bias):
    """Forward of SingleConv2dSyntheticWeightModel. x: (N, 3, H, W) NCHW f32."""
    out = _pallas_conv2d_degenerate(x, w_base)              # (N, OH, OW)
    # All C_out channels are identical up to bias (weight[o][i] == base):
    return out[:, None, :, :] + bias[None, :, None, None]   # (N, C_OUT, OH, OW)


if __name__ == "__main__":
    # Kernel is 100x100, so spatial must be >= 100. Use 104 -> 5x5 output.
    key = jax.random.PRNGKey(0)
    x = jax.random.normal(key, (2, C_IN, 104, 104), dtype=jnp.float32)

    w_base, bias = make_synthetic_params()

    y = single_conv2d_forward(x, w_base, bias)
    y = jax.block_until_ready(y)
    assert y.shape == (2, C_OUT, 5, 5), y.shape

    # Reference: XLA's native convolution with the FULL degenerate OIHW weight
    # (same semantics as the torch module), full f32 accuracy.
    w_full = jnp.broadcast_to(w_base, (C_OUT, C_IN, KH, KW))
    y_ref = lax.conv_general_dilated(
        x, w_full, window_strides=(1, 1), padding="VALID",
        dimension_numbers=("NCHW", "OIHW", "NCHW"),
        precision=lax.Precision.HIGHEST,
    ) + bias.reshape(1, C_OUT, 1, 1)
    # Outputs are ~1e6 in magnitude (weights up to 9999, K=30000); rtol covers
    # typical values, atol covers f32 accumulation-order drift near zero.
    np.testing.assert_allclose(np.asarray(y), np.asarray(y_ref), rtol=2e-3, atol=256.0)

    print("KERNEL_OK")
</pallas_src>

<mosaic_0001>
module attributes {stable_mosaic.version = 11 : i64} {
  func.func @_degenerate_conv_kernel(%arg0: i32, %arg1: memref<1x5x104x128xf32, #tpu.memory_space<vmem>>, %arg2: memref<5x104x128xf32, #tpu.memory_space<vmem>>, %arg3: memref<1x5x5xf32, #tpu.memory_space<vmem>>) attributes {dimension_semantics = [#tpu.dimension_semantics<parallel>], iteration_bounds = array<i64: 2>, scalar_prefetch = 0 : i64, scratch_operands = 0 : i64, tpu.core_type = #tpu.core_type<tc>, window_params = [{transform_indices = @transform_0, window_bounds = array<i64: 1, 5, 104, 128>}, {pipeline_mode = #tpu.pipeline_mode<synchronous>, transform_indices = @transform_1, window_bounds = array<i64: 5, 104, 128>}, {transform_indices = @transform_2, window_bounds = array<i64: 1, 5, 5>}]} {
    %0 = tpu.iota {dimensions = array<i32: 0>} : vector<5x5xi32>
    %1 = tpu.iota {dimensions = array<i32: 1>} : vector<5x5xi32>
    %cst = arith.constant 0.000000e+00 : f32
    %2 = vector.broadcast %cst : f32 to vector<5x5xf32>
    %c0 = arith.constant 0 : index
    %c0_0 = arith.constant 0 : index
    %c0_1 = arith.constant 0 : index
    %c0_2 = arith.constant 0 : index
    %3 = vector.load %arg1[%c0, %c0_0, %c0_1, %c0_2] : memref<1x5x104x128xf32, #tpu.memory_space<vmem>>, vector<1x1x104x128xf32>
    %4 = vector.shape_cast %3 : vector<1x1x104x128xf32> to vector<104x128xf32>
    %c0_3 = arith.constant 0 : index
    %c0_4 = arith.constant 0 : index
    %c0_5 = arith.constant 0 : index
    %5 = vector.load %arg2[%c0_3, %c0_4, %c0_5] : memref<5x104x128xf32, #tpu.memory_space<vmem>>, vector<1x104x128xf32>
    %6 = vector.shape_cast %5 : vector<1x104x128xf32> to vector<104x128xf32>
    %7 = arith.mulf %4, %6 : vector<104x128xf32>
    %8 = vector.shape_cast %7 : vector<104x128xf32> to vector<1x104x128xf32>
    %cst_6 = arith.constant dense<0.000000e+00> : vector<1xf32>
    %9 = vector.multi_reduction <add>, %8, %cst_6 [1, 2] : vector<1x104x128xf32> to vector<1xf32>
    %10 = vector.shape_cast %9 : vector<1xf32> to vector<1x1x1xf32>
    %11 = vector.extract %10[0, 0, 0] : f32 from vector<1x1x1xf32>
    %c0_i32 = arith.constant 0 : i32
    %12 = vector.broadcast %c0_i32 : i32 to vector<5x5xi32>
    %13 = arith.cmpi eq, %0, %12 : vector<5x5xi32>
    %c0_i32_7 = arith.constant 0 : i32
    %14 = vector.broadcast %c0_i32_7 : i32 to vector<5x5xi32>
    %15 = arith.cmpi eq, %1, %14 : vector<5x5xi32>
    %16 = arith.andi %13, %15 : vector<5x5xi1>
    %17 = vector.broadcast %11 : f32 to vector<5x5xf32>
    %18 = arith.select %16, %17, %2 : vector<5x5xi1>, vector<5x5xf32>
    %c1 = arith.constant 1 : index
    %c0_8 = arith.constant 0 : index
    %c0_9 = arith.constant 0 : index
    %19 = vector.load %arg2[%c1, %c0_8, %c0_9] : memref<5x104x128xf32, #tpu.memory_space<vmem>>, vector<1x104x128xf32>
    %20 = vector.shape_cast %19 : vector<1x104x128xf32> to vector<104x128xf32>
    %21 = arith.mulf %4, %20 : vector<104x128xf32>
    %22 = vector.shape_cast %21 : vector<104x128xf32> to vector<1x104x128xf32>
    %cst_10 = arith.constant dense<0.000000e+00> : vector<1xf32>
    %23 = vector.multi_reduction <add>, %22, %cst_10 [1, 2] : vector<1x104x128xf32> to vector<1xf32>
    %24 = vector.shape_cast %23 : vector<1xf32> to vector<1x1x1xf32>
    %25 = vector.extract %24[0, 0, 0] : f32 from vector<1x1x1xf32>
    %c1_i32 = arith.constant 1 : i32
    %26 = vector.broadcast %c1_i32 : i32 to vector<5x5xi32>
    %27 = arith.cmpi eq, %0, %26 : vector<5x5xi32>
    %c0_i32_11 = arith.constant 0 : i32
    %28 = vector.broadcast %c0_i32_11 : i32 to vector<5x5xi32>
    %29 = arith.cmpi eq, %1, %28 : vector<5x5xi32>
    %30 = arith.andi %27, %29 : vector<5x5xi1>
    %31 = vector.broadcast %25 : f32 to vector<5x5xf32>
    %32 = arith.select %30, %31, %18 : vector<5x5xi1>, vector<5x5xf32>
    %c2 = arith.constant 2 : index
    %c0_12 = arith.constant 0 : index
    %c0_13 = arith.constant 0 : index
    %33 = vector.load %arg2[%c2, %c0_12, %c0_13] : memref<5x104x128xf32, #tpu.memory_space<vmem>>, vector<1x104x128xf32>
    %34 = vector.shape_cast %33 : vector<1x104x128xf32> to vector<104x128xf32>
    %35 = arith.mulf %4, %34 : vector<104x128xf32>
    %36 = vector.shape_cast %35 : vector<104x128xf32> to vector<1x104x128xf32>
    %cst_14 = arith.constant dense<0.000000e+00> : vector<1xf32>
    %37 = vector.multi_reduction <add>, %36, %cst_14 [1, 2] : vector<1x104x128xf32> to vector<1xf32>
    %38 = vector.shape_cast %37 : vector<1xf32> to vector<1x1x1xf32>
    %39 = vector.extract %38[0, 0, 0] : f32 from vector<1x1x1xf32>
    %c2_i32 = arith.constant 2 : i32
    %40 = vector.broadcast %c2_i32 : i32 to vector<5x5xi32>
    %41 = arith.cmpi eq, %0, %40 : vector<5x5xi32>
    %c0_i32_15 = arith.constant 0 : i32
    %42 = vector.broadcast %c0_i32_15 : i32 to vector<5x5xi32>
    %43 = arith.cmpi eq, %1, %42 : vector<5x5xi32>
    %44 = arith.andi %41, %43 : vector<5x5xi1>
    %45 = vector.broadcast %39 : f32 to vector<5x5xf32>
    %46 = arith.select %44, %45, %32 : vector<5x5xi1>, vector<5x5xf32>
    %c3 = arith.constant 3 : index
    %c0_16 = arith.constant 0 : index
    %c0_17 = arith.constant 0 : index
    %47 = vector.load %arg2[%c3, %c0_16, %c0_17] : memref<5x104x128xf32, #tpu.memory_space<vmem>>, vector<1x104x128xf32>
    %48 = vector.shape_cast %47 : vector<1x104x128xf32> to vector<104x128xf32>
    %49 = arith.mulf %4, %48 : vector<104x128xf32>
    %50 = vector.shape_cast %49 : vector<104x128xf32> to vector<1x104x128xf32>
    %cst_18 = arith.constant dense<0.000000e+00> : vector<1xf32>
    %51 = vector.multi_reduction <add>, %50, %cst_18 [1, 2] : vector<1x104x128xf32> to vector<1xf32>
    %52 = vector.shape_cast %51 : vector<1xf32> to vector<1x1x1xf32>
    %53 = vector.extract %52[0, 0, 0] : f32 from vector<1x1x1xf32>
    %c3_i32 = arith.constant 3 : i32
    %54 = vector.broadcast %c3_i32 : i32 to vector<5x5xi32>
    %55 = arith.cmpi eq, %0, %54 : vector<5x5xi32>
    %c0_i32_19 = arith.constant 0 : i32
    %56 = vector.broadcast %c0_i32_19 : i32 to vector<5x5xi32>
    %57 = arith.cmpi eq, %1, %56 : vector<5x5xi32>
    %58 = arith.andi %55, %57 : vector<5x5xi1>
    %59 = vector.broadcast %53 : f32 to vector<5x5xf32>
    %60 = arith.select %58, %59, %46 : vector<5x5xi1>, vector<5x5xf32>
    %c4 = arith.constant 4 : index
    %c0_20 = arith.constant 0 : index
    %c0_21 = arith.constant 0 : index
    %61 = vector.load %arg2[%c4, %c0_20, %c0_21] : memref<5x104x128xf32, #tpu.memory_space<vmem>>, vector<1x104x128xf32>
    %62 = vector.shape_cast %61 : vector<1x104x128xf32> to vector<104x128xf32>
    %63 = arith.mulf %4, %62 : vector<104x128xf32>
    %64 = vector.shape_cast %63 : vector<104x128xf32> to vector<1x104x128xf32>
    %cst_22 = arith.constant dense<0.000000e+00> : vector<1xf32>
    %65 = vector.multi_reduction <add>, %64, %cst_22 [1, 2] : vector<1x104x128xf32> to vector<1xf32>
    %66 = vector.shape_cast %65 : vector<1xf32> to vector<1x1x1xf32>
    %67 = vector.extract %66[0, 0, 0] : f32 from vector<1x1x1xf32>
    %c4_i32 = arith.constant 4 : i32
    %68 = vector.broadcast %c4_i32 : i32 to vector<5x5xi32>
    %69 = arith.cmpi eq, %0, %68 : vector<5x5xi32>
    %c0_i32_23 = arith.constant 0 : i32
    %70 = vector.broadcast %c0_i32_23 : i32 to vector<5x5xi32>
    %71 = arith.cmpi eq, %1, %70 : vector<5x5xi32>
    %72 = arith.andi %69, %71 : vector<5x5xi1>
    %73 = vector.broadcast %67 : f32 to vector<5x5xf32>
    %74 = arith.select %72, %73, %60 : vector<5x5xi1>, vector<5x5xf32>
    %c0_24 = arith.constant 0 : index
    %c1_25 = arith.constant 1 : index
    %c0_26 = arith.constant 0 : index
    %c0_27 = arith.constant 0 : index
    %75 = vector.load %arg1[%c0_24, %c1_25, %c0_26, %c0_27] : memref<1x5x104x128xf32, #tpu.memory_space<vmem>>, vector<1x1x104x128xf32>
    %76 = vector.shape_cast %75 : vector<1x1x104x128xf32> to vector<104x128xf32>
    %c0_28 = arith.constant 0 : index
    %c0_29 = arith.constant 0 : index
    %c0_30 = arith.constant 0 : index
    %77 = vector.load %arg2[%c0_28, %c0_29, %c0_30] : memref<5x104x128xf32, #tpu.memory_space<vmem>>, vector<1x104x128xf32>
    %78 = vector.shape_cast %77 : vector<1x104x128xf32> to vector<104x128xf32>
    %79 = arith.mulf %76, %78 : vector<104x128xf32>
    %80 = vector.shape_cast %79 : vector<104x128xf32> to vector<1x104x128xf32>
    %cst_31 = arith.constant dense<0.000000e+00> : vector<1xf32>
    %81 = vector.multi_reduction <add>, %80, %cst_31 [1, 2] : vector<1x104x128xf32> to vector<1xf32>
    %82 = vector.shape_cast %81 : vector<1xf32> to vector<1x1x1xf32>
    %83 = vector.extract %82[0, 0, 0] : f32 from vector<1x1x1xf32>
    %c0_i32_32 = arith.constant 0 : i32
    %84 = vector.broadcast %c0_i32_32 : i32 to vector<5x5xi32>
    %85 = arith.cmpi eq, %0, %84 : vector<5x5xi32>
    %c1_i32_33 = arith.constant 1 : i32
    %86 = vector.broadcast %c1_i32_33 : i32 to vector<5x5xi32>
    %87 = arith.cmpi eq, %1, %86 : vector<5x5xi32>
    %88 = arith.andi %85, %87 : vector<5x5xi1>
    %89 = vector.broadcast %83 : f32 to vector<5x5xf32>
    %90 = arith.select %88, %89, %74 : vector<5x5xi1>, vector<5x5xf32>
    %c1_34 = arith.constant 1 : index
    %c0_35 = arith.constant 0 : index
    %c0_36 = arith.constant 0 : index
    %91 = vector.load %arg2[%c1_34, %c0_35, %c0_36] : memref<5x104x128xf32, #tpu.memory_space<vmem>>, vector<1x104x128xf32>
    %92 = vector.shape_cast %91 : vector<1x104x128xf32> to vector<104x128xf32>
    %93 = arith.mulf %76, %92 : vector<104x128xf32>
    %94 = vector.shape_cast %93 : vector<104x128xf32> to vector<1x104x128xf32>
    %cst_37 = arith.constant dense<0.000000e+00> : vector<1xf32>
    %95 = vector.multi_reduction <add>, %94, %cst_37 [1, 2] : vector<1x104x128xf32> to vector<1xf32>
    %96 = vector.shape_cast %95 : vector<1xf32> to vector<1x1x1xf32>
    %97 = vector.extract %96[0, 0, 0] : f32 from vector<1x1x1xf32>
    %c1_i32_38 = arith.constant 1 : i32
    %98 = vector.broadcast %c1_i32_38 : i32 to vector<5x5xi32>
    %99 = arith.cmpi eq, %0, %98 : vector<5x5xi32>
    %c1_i32_39 = arith.constant 1 : i32
    %100 = vector.broadcast %c1_i32_39 : i32 to vector<5x5xi32>
    %101 = arith.cmpi eq, %1, %100 : vector<5x5xi32>
    %102 = arith.andi %99, %101 : vector<5x5xi1>
    %103 = vector.broadcast %97 : f32 to vector<5x5xf32>
    %104 = arith.select %102, %103, %90 : vector<5x5xi1>, vector<5x5xf32>
    %c2_40 = arith.constant 2 : index
    %c0_41 = arith.constant 0 : index
    %c0_42 = arith.constant 0 : index
    %105 = vector.load %arg2[%c2_40, %c0_41, %c0_42] : memref<5x104x128xf32, #tpu.memory_space<vmem>>, vector<1x104x128xf32>
    %106 = vector.shape_cast %105 : vector<1x104x128xf32> to vector<104x128xf32>
    %107 = arith.mulf %76, %106 : vector<104x128xf32>
    %108 = vector.shape_cast %107 : vector<104x128xf32> to vector<1x104x128xf32>
    %cst_43 = arith.constant dense<0.000000e+00> : vector<1xf32>
    %109 = vector.multi_reduction <add>, %108, %cst_43 [1, 2] : vector<1x104x128xf32> to vector<1xf32>
    %110 = vector.shape_cast %109 : vector<1xf32> to vector<1x1x1xf32>
    %111 = vector.extract %110[0, 0, 0] : f32 from vector<1x1x1xf32>
    %c2_i32_44 = arith.constant 2 : i32
    %112 = vector.broadcast %c2_i32_44 : i32 to vector<5x5xi32>
    %113 = arith.cmpi eq, %0, %112 : vector<5x5xi32>
    %c1_i32_45 = arith.constant 1 : i32
    %114 = vector.broadcast %c1_i32_45 : i32 to vector<5x5xi32>
    %115 = arith.cmpi eq, %1, %114 : vector<5x5xi32>
    %116 = arith.andi %113, %115 : vector<5x5xi1>
    %117 = vector.broadcast %111 : f32 to vector<5x5xf32>
    %118 = arith.select %116, %117, %104 : vector<5x5xi1>, vector<5x5xf32>
    %c3_46 = arith.constant 3 : index
    %c0_47 = arith.constant 0 : index
    %c0_48 = arith.constant 0 : index
    %119 = vector.load %arg2[%c3_46, %c0_47, %c0_48] : memref<5x104x128xf32, #tpu.memory_space<vmem>>, vector<1x104x128xf32>
    %120 = vector.shape_cast %119 : vector<1x104x128xf32> to vector<104x128xf32>
    %121 = arith.mulf %76, %120 : vector<104x128xf32>
    %122 = vector.shape_cast %121 : vector<104x128xf32> to vector<1x104x128xf32>
    %cst_49 = arith.constant dense<0.000000e+00> : vector<1xf32>
    %123 = vector.multi_reduction <add>, %122, %cst_49 [1, 2] : vector<1x104x128xf32> to vector<1xf32>
    %124 = vector.shape_cast %123 : vector<1xf32> to vector<1x1x1xf32>
    %125 = vector.extract %124[0, 0, 0] : f32 from vector<1x1x1xf32>
    %c3_i32_50 = arith.constant 3 : i32
    %126 = vector.broadcast %c3_i32_50 : i32 to vector<5x5xi32>
    %127 = arith.cmpi eq, %0, %126 : vector<5x5xi32>
    %c1_i32_51 = arith.constant 1 : i32
    %128 = vector.broadcast %c1_i32_51 : i32 to vector<5x5xi32>
    %129 = arith.cmpi eq, %1, %128 : vector<5x5xi32>
    %130 = arith.andi %127, %129 : vector<5x5xi1>
    %131 = vector.broadcast %125 : f32 to vector<5x5xf32>
    %132 = arith.select %130, %131, %118 : vector<5x5xi1>, vector<5x5xf32>
    %c4_52 = arith.constant 4 : index
    %c0_53 = arith.constant 0 : index
    %c0_54 = arith.constant 0 : index
    %133 = vector.load %arg2[%c4_52, %c0_53, %c0_54] : memref<5x104x128xf32, #tpu.memory_space<vmem>>, vector<1x104x128xf32>
    %134 = vector.shape_cast %133 : vector<1x104x128xf32> to vector<104x128xf32>
    %135 = arith.mulf %76, %134 : vector<104x128xf32>
    %136 = vector.shape_cast %135 : vector<104x128xf32> to vector<1x104x128xf32>
    %cst_55 = arith.constant dense<0.000000e+00> : vector<1xf32>
    %137 = vector.multi_reduction <add>, %136, %cst_55 [1, 2] : vector<1x104x128xf32> to vector<1xf32>
    %138 = vector.shape_cast %137 : vector<1xf32> to vector<1x1x1xf32>
    %139 = vector.extract %138[0, 0, 0] : f32 from vector<1x1x1xf32>
    %c4_i32_56 = arith.constant 4 : i32
    %140 = vector.broadcast %c4_i32_56 : i32 to vector<5x5xi32>
    %141 = arith.cmpi eq, %0, %140 : vector<5x5xi32>
    %c1_i32_57 = arith.constant 1 : i32
    %142 = vector.broadcast %c1_i32_57 : i32 to vector<5x5xi32>
    %143 = arith.cmpi eq, %1, %142 : vector<5x5xi32>
    %144 = arith.andi %141, %143 : vector<5x5xi1>
    %145 = vector.broadcast %139 : f32 to vector<5x5xf32>
    %146 = arith.select %144, %145, %132 : vector<5x5xi1>, vector<5x5xf32>
    %c0_58 = arith.constant 0 : index
    %c2_59 = arith.constant 2 : index
    %c0_60 = arith.constant 0 : index
    %c0_61 = arith.constant 0 : index
    %147 = vector.load %arg1[%c0_58, %c2_59, %c0_60, %c0_61] : memref<1x5x104x128xf32, #tpu.memory_space<vmem>>, vector<1x1x104x128xf32>
    %148 = vector.shape_cast %147 : vector<1x1x104x128xf32> to vector<104x128xf32>
    %c0_62 = arith.constant 0 : index
    %c0_63 = arith.constant 0 : index
    %c0_64 = arith.constant 0 : index
    %149 = vector.load %arg2[%c0_62, %c0_63, %c0_64] : memref<5x104x128xf32, #tpu.memory_space<vmem>>, vector<1x104x128xf32>
    %150 = vector.shape_cast %149 : vector<1x104x128xf32> to vector<104x128xf32>
    %151 = arith.mulf %148, %150 : vector<104x128xf32>
    %152 = vector.shape_cast %151 : vector<104x128xf32> to vector<1x104x128xf32>
    %cst_65 = arith.constant dense<0.000000e+00> : vector<1xf32>
    %153 = vector.multi_reduction <add>, %152, %cst_65 [1, 2] : vector<1x104x128xf32> to vector<1xf32>
    %154 = vector.shape_cast %153 : vector<1xf32> to vector<1x1x1xf32>
    %155 = vector.extract %154[0, 0, 0] : f32 from vector<1x1x1xf32>
    %c0_i32_66 = arith.constant 0 : i32
    %156 = vector.broadcast %c0_i32_66 : i32 to vector<5x5xi32>
    %157 = arith.cmpi eq, %0, %156 : vector<5x5xi32>
    %c2_i32_67 = arith.constant 2 : i32
    %158 = vector.broadcast %c2_i32_67 : i32 to vector<5x5xi32>
    %159 = arith.cmpi eq, %1, %158 : vector<5x5xi32>
    %160 = arith.andi %157, %159 : vector<5x5xi1>
    %161 = vector.broadcast %155 : f32 to vector<5x5xf32>
    %162 = arith.select %160, %161, %146 : vector<5x5xi1>, vector<5x5xf32>
    %c1_68 = arith.constant 1 : index
    %c0_69 = arith.constant 0 : index
    %c0_70 = arith.constant 0 : index
    %163 = vector.load %arg2[%c1_68, %c0_69, %c0_70] : memref<5x104x128xf32, #tpu.memory_space<vmem>>, vector<1x104x128xf32>
    %164 = vector.shape_cast %163 : vector<1x104x128xf32> to vector<104x128xf32>
    %165 = arith.mulf %148, %164 : vector<104x128xf32>
    %166 = vector.shape_cast %165 : vector<104x128xf32> to vector<1x104x128xf32>
    %cst_71 = arith.constant dense<0.000000e+00> : vector<1xf32>
    %167 = vector.multi_reduction <add>, %166, %cst_71 [1, 2] : vector<1x104x128xf32> to vector<1xf32>
    %168 = vector.shape_cast %167 : vector<1xf32> to vector<1x1x1xf32>
    %169 = vector.extract %168[0, 0, 0] : f32 from vector<1x1x1xf32>
    %c1_i32_72 = arith.constant 1 : i32
    %170 = vector.broadcast %c1_i32_72 : i32 to vector<5x5xi32>
    %171 = arith.cmpi eq, %0, %170 : vector<5x5xi32>
    %c2_i32_73 = arith.constant 2 : i32
    %172 = vector.broadcast %c2_i32_73 : i32 to vector<5x5xi32>
    %173 = arith.cmpi eq, %1, %172 : vector<5x5xi32>
    %174 = arith.andi %171, %173 : vector<5x5xi1>
    %175 = vector.broadcast %169 : f32 to vector<5x5xf32>
    %176 = arith.select %174, %175, %162 : vector<5x5xi1>, vector<5x5xf32>
    %c2_74 = arith.constant 2 : index
    %c0_75 = arith.constant 0 : index
    %c0_76 = arith.constant 0 : index
    %177 = vector.load %arg2[%c2_74, %c0_75, %c0_76] : memref<5x104x128xf32, #tpu.memory_space<vmem>>, vector<1x104x128xf32>
    %178 = vector.shape_cast %177 : vector<1x104x128xf32> to vector<104x128xf32>
    %179 = arith.mulf %148, %178 : vector<104x128xf32>
    %180 = vector.shape_cast %179 : vector<104x128xf32> to vector<1x104x128xf32>
    %cst_77 = arith.constant dense<0.000000e+00> : vector<1xf32>
    %181 = vector.multi_reduction <add>, %180, %cst_77 [1, 2] : vector<1x104x128xf32> to vector<1xf32>
    %182 = vector.shape_cast %181 : vector<1xf32> to vector<1x1x1xf32>
    %183 = vector.extract %182[0, 0, 0] : f32 from vector<1x1x1xf32>
    %c2_i32_78 = arith.constant 2 : i32
    %184 = vector.broadcast %c2_i32_78 : i32 to vector<5x5xi32>
    %185 = arith.cmpi eq, %0, %184 : vector<5x5xi32>
    %c2_i32_79 = arith.constant 2 : i32
    %186 = vector.broadcast %c2_i32_79 : i32 to vector<5x5xi32>
    %187 = arith.cmpi eq, %1, %186 : vector<5x5xi32>
    %188 = arith.andi %185, %187 : vector<5x5xi1>
    %189 = vector.broadcast %183 : f32 to vector<5x5xf32>
    %190 = arith.select %188, %189, %176 : vector<5x5xi1>, vector<5x5xf32>
    %c3_80 = arith.constant 3 : index
    %c0_81 = arith.constant 0 : index
    %c0_82 = arith.constant 0 : index
    %191 = vector.load %arg2[%c3_80, %c0_81, %c0_82] : memref<5x104x128xf32, #tpu.memory_space<vmem>>, vector<1x104x128xf32>
    %192 = vector.shape_cast %191 : vector<1x104x128xf32> to vector<104x128xf32>
    %193 = arith.mulf %148, %192 : vector<104x128xf32>
    %194 = vector.shape_cast %193 : vector<104x128xf32> to vector<1x104x128xf32>
    %cst_83 = arith.constant dense<0.000000e+00> : vector<1xf32>
    %195 = vector.multi_reduction <add>, %194, %cst_83 [1, 2] : vector<1x104x128xf32> to vector<1xf32>
    %196 = vector.shape_cast %195 : vector<1xf32> to vector<1x1x1xf32>
    %197 = vector.extract %196[0, 0, 0] : f32 from vector<1x1x1xf32>
    %c3_i32_84 = arith.constant 3 : i32
    %198 = vector.broadcast %c3_i32_84 : i32 to vector<5x5xi32>
    %199 = arith.cmpi eq, %0, %198 : vector<5x5xi32>
    %c2_i32_85 = arith.constant 2 : i32
    %200 = vector.broadcast %c2_i32_85 : i32 to vector<5x5xi32>
    %201 = arith.cmpi eq, %1, %200 : vector<5x5xi32>
    %202 = arith.andi %199, %201 : vector<5x5xi1>
    %203 = vector.broadcast %197 : f32 to vector<5x5xf32>
    %204 = arith.select %202, %203, %190 : vector<5x5xi1>, vector<5x5xf32>
    %c4_86 = arith.constant 4 : index
    %c0_87 = arith.constant 0 : index
    %c0_88 = arith.constant 0 : index
    %205 = vector.load %arg2[%c4_86, %c0_87, %c0_88] : memref<5x104x128xf32, #tpu.memory_space<vmem>>, vector<1x104x128xf32>
    %206 = vector.shape_cast %205 : vector<1x104x128xf32> to vector<104x128xf32>
    %207 = arith.mulf %148, %206 : vector<104x128xf32>
    %208 = vector.shape_cast %207 : vector<104x128xf32> to vector<1x104x128xf32>
    %cst_89 = arith.constant dense<0.000000e+00> : vector<1xf32>
    %209 = vector.multi_reduction <add>, %208, %cst_89 [1, 2] : vector<1x104x128xf32> to vector<1xf32>
    %210 = vector.shape_cast %209 : vector<1xf32> to vector<1x1x1xf32>
    %211 = vector.extract %210[0, 0, 0] : f32 from vector<1x1x1xf32>
    %c4_i32_90 = arith.constant 4 : i32
    %212 = vector.broadcast %c4_i32_90 : i32 to vector<5x5xi32>
    %213 = arith.cmpi eq, %0, %212 : vector<5x5xi32>
    %c2_i32_91 = arith.constant 2 : i32
    %214 = vector.broadcast %c2_i32_91 : i32 to vector<5x5xi32>
    %215 = arith.cmpi eq, %1, %214 : vector<5x5xi32>
    %216 = arith.andi %213, %215 : vector<5x5xi1>
    %217 = vector.broadcast %211 : f32 to vector<5x5xf32>
    %218 = arith.select %216, %217, %204 : vector<5x5xi1>, vector<5x5xf32>
    %c0_92 = arith.constant 0 : index
    %c3_93 = arith.constant 3 : index
    %c0_94 = arith.constant 0 : index
    %c0_95 = arith.constant 0 : index
    %219 = vector.load %arg1[%c0_92, %c3_93, %c0_94, %c0_95] : memref<1x5x104x128xf32, #tpu.memory_space<vmem>>, vector<1x1x104x128xf32>
    %220 = vector.shape_cast %219 : vector<1x1x104x128xf32> to vector<104x128xf32>
    %c0_96 = arith.constant 0 : index
    %c0_97 = arith.constant 0 : index
    %c0_98 = arith.constant 0 : index
    %221 = vector.load %arg2[%c0_96, %c0_97, %c0_98] : memref<5x104x128xf32, #tpu.memory_space<vmem>>, vector<1x104x128xf32>
    %222 = vector.shape_cast %221 : vector<1x104x128xf32> to vector<104x128xf32>
    %223 = arith.mulf %220, %222 : vector<104x128xf32>
    %224 = vector.shape_cast %223 : vector<104x128xf32> to vector<1x104x128xf32>
    %cst_99 = arith.constant dense<0.000000e+00> : vector<1xf32>
    %225 = vector.multi_reduction <add>, %224, %cst_99 [1, 2] : vector<1x104x128xf32> to vector<1xf32>
    %226 = vector.shape_cast %225 : vector<1xf32> to vector<1x1x1xf32>
    %227 = vector.extract %226[0, 0, 0] : f32 from vector<1x1x1xf32>
    %c0_i32_100 = arith.constant 0 : i32
    %228 = vector.broadcast %c0_i32_100 : i32 to vector<5x5xi32>
    %229 = arith.cmpi eq, %0, %228 : vector<5x5xi32>
    %c3_i32_101 = arith.constant 3 : i32
    %230 = vector.broadcast %c3_i32_101 : i32 to vector<5x5xi32>
    %231 = arith.cmpi eq, %1, %230 : vector<5x5xi32>
    %232 = arith.andi %229, %231 : vector<5x5xi1>
    %233 = vector.broadcast %227 : f32 to vector<5x5xf32>
    %234 = arith.select %232, %233, %218 : vector<5x5xi1>, vector<5x5xf32>
    %c1_102 = arith.constant 1 : index
    %c0_103 = arith.constant 0 : index
    %c0_104 = arith.constant 0 : index
    %235 = vector.load %arg2[%c1_102, %c0_103, %c0_104] : memref<5x104x128xf32, #tpu.memory_space<vmem>>, vector<1x104x128xf32>
    %236 = vector.shape_cast %235 : vector<1x104x128xf32> to vector<104x128xf32>
    %237 = arith.mulf %220, %236 : vector<104x128xf32>
    %238 = vector.shape_cast %237 : vector<104x128xf32> to vector<1x104x128xf32>
    %cst_105 = arith.constant dense<0.000000e+00> : vector<1xf32>
    %239 = vector.multi_reduction <add>, %238, %cst_105 [1, 2] : vector<1x104x128xf32> to vector<1xf32>
    %240 = vector.shape_cast %239 : vector<1xf32> to vector<1x1x1xf32>
    %241 = vector.extract %240[0, 0, 0] : f32 from vector<1x1x1xf32>
    %c1_i32_106 = arith.constant 1 : i32
    %242 = vector.broadcast %c1_i32_106 : i32 to vector<5x5xi32>
    %243 = arith.cmpi eq, %0, %242 : vector<5x5xi32>
    %c3_i32_107 = arith.constant 3 : i32
    %244 = vector.broadcast %c3_i32_107 : i32 to vector<5x5xi32>
    %245 = arith.cmpi eq, %1, %244 : vector<5x5xi32>
    %246 = arith.andi %243, %245 : vector<5x5xi1>
    %247 = vector.broadcast %241 : f32 to vector<5x5xf32>
    %248 = arith.select %246, %247, %234 : vector<5x5xi1>, vector<5x5xf32>
    %c2_108 = arith.constant 2 : index
    %c0_109 = arith.constant 0 : index
    %c0_110 = arith.constant 0 : index
    %249 = vector.load %arg2[%c2_108, %c0_109, %c0_110] : memref<5x104x128xf32, #tpu.memory_space<vmem>>, vector<1x104x128xf32>
    %250 = vector.shape_cast %249 : vector<1x104x128xf32> to vector<104x128xf32>
    %251 = arith.mulf %220, %250 : vector<104x128xf32>
    %252 = vector.shape_cast %251 : vector<104x128xf32> to vector<1x104x128xf32>
    %cst_111 = arith.constant dense<0.000000e+00> : vector<1xf32>
    %253 = vector.multi_reduction <add>, %252, %cst_111 [1, 2] : vector<1x104x128xf32> to vector<1xf32>
    %254 = vector.shape_cast %253 : vector<1xf32> to vector<1x1x1xf32>
    %255 = vector.extract %254[0, 0, 0] : f32 from vector<1x1x1xf32>
    %c2_i32_112 = arith.constant 2 : i32
    %256 = vector.broadcast %c2_i32_112 : i32 to vector<5x5xi32>
    %257 = arith.cmpi eq, %0, %256 : vector<5x5xi32>
    %c3_i32_113 = arith.constant 3 : i32
    %258 = vector.broadcast %c3_i32_113 : i32 to vector<5x5xi32>
    %259 = arith.cmpi eq, %1, %258 : vector<5x5xi32>
    %260 = arith.andi %257, %259 : vector<5x5xi1>
    %261 = vector.broadcast %255 : f32 to vector<5x5xf32>
    %262 = arith.select %260, %261, %248 : vector<5x5xi1>, vector<5x5xf32>
    %c3_114 = arith.constant 3 : index
    %c0_115 = arith.constant 0 : index
    %c0_116 = arith.constant 0 : index
    %263 = vector.load %arg2[%c3_114, %c0_115, %c0_116] : memref<5x104x128xf32, #tpu.memory_space<vmem>>, vector<1x104x128xf32>
    %264 = vector.shape_cast %263 : vector<1x104x128xf32> to vector<104x128xf32>
    %265 = arith.mulf %220, %264 : vector<104x128xf32>
    %266 = vector.shape_cast %265 : vector<104x128xf32> to vector<1x104x128xf32>
    %cst_117 = arith.constant dense<0.000000e+00> : vector<1xf32>
    %267 = vector.multi_reduction <add>, %266, %cst_117 [1, 2] : vector<1x104x128xf32> to vector<1xf32>
    %268 = vector.shape_cast %267 : vector<1xf32> to vector<1x1x1xf32>
    %269 = vector.extract %268[0, 0, 0] : f32 from vector<1x1x1xf32>
    %c3_i32_118 = arith.constant 3 : i32
    %270 = vector.broadcast %c3_i32_118 : i32 to vector<5x5xi32>
    %271 = arith.cmpi eq, %0, %270 : vector<5x5xi32>
    %c3_i32_119 = arith.constant 3 : i32
    %272 = vector.broadcast %c3_i32_119 : i32 to vector<5x5xi32>
    %273 = arith.cmpi eq, %1, %272 : vector<5x5xi32>
    %274 = arith.andi %271, %273 : vector<5x5xi1>
    %275 = vector.broadcast %269 : f32 to vector<5x5xf32>
    %276 = arith.select %274, %275, %262 : vector<5x5xi1>, vector<5x5xf32>
    %c4_120 = arith.constant 4 : index
    %c0_121 = arith.constant 0 : index
    %c0_122 = arith.constant 0 : index
    %277 = vector.load %arg2[%c4_120, %c0_121, %c0_122] : memref<5x104x128xf32, #tpu.memory_space<vmem>>, vector<1x104x128xf32>
    %278 = vector.shape_cast %277 : vector<1x104x128xf32> to vector<104x128xf32>
    %279 = arith.mulf %220, %278 : vector<104x128xf32>
    %280 = vector.shape_cast %279 : vector<104x128xf32> to vector<1x104x128xf32>
    %cst_123 = arith.constant dense<0.000000e+00> : vector<1xf32>
    %281 = vector.multi_reduction <add>, %280, %cst_123 [1, 2] : vector<1x104x128xf32> to vector<1xf32>
    %282 = vector.shape_cast %281 : vector<1xf32> to vector<1x1x1xf32>
    %283 = vector.extract %282[0, 0, 0] : f32 from vector<1x1x1xf32>
    %c4_i32_124 = arith.constant 4 : i32
    %284 = vector.broadcast %c4_i32_124 : i32 to vector<5x5xi32>
    %285 = arith.cmpi eq, %0, %284 : vector<5x5xi32>
    %c3_i32_125 = arith.constant 3 : i32
    %286 = vector.broadcast %c3_i32_125 : i32 to vector<5x5xi32>
    %287 = arith.cmpi eq, %1, %286 : vector<5x5xi32>
    %288 = arith.andi %285, %287 : vector<5x5xi1>
    %289 = vector.broadcast %283 : f32 to vector<5x5xf32>
    %290 = arith.select %288, %289, %276 : vector<5x5xi1>, vector<5x5xf32>
    %c0_126 = arith.constant 0 : index
    %c4_127 = arith.constant 4 : index
    %c0_128 = arith.constant 0 : index
    %c0_129 = arith.constant 0 : index
    %291 = vector.load %arg1[%c0_126, %c4_127, %c0_128, %c0_129] : memref<1x5x104x128xf32, #tpu.memory_space<vmem>>, vector<1x1x104x128xf32>
    %292 = vector.shape_cast %291 : vector<1x1x104x128xf32> to vector<104x128xf32>
    %c0_130 = arith.constant 0 : index
    %c0_131 = arith.constant 0 : index
    %c0_132 = arith.constant 0 : index
    %293 = vector.load %arg2[%c0_130, %c0_131, %c0_132] : memref<5x104x128xf32, #tpu.memory_space<vmem>>, vector<1x104x128xf32>
    %294 = vector.shape_cast %293 : vector<1x104x128xf32> to vector<104x128xf32>
    %295 = arith.mulf %292, %294 : vector<104x128xf32>
    %296 = vector.shape_cast %295 : vector<104x128xf32> to vector<1x104x128xf32>
    %cst_133 = arith.constant dense<0.000000e+00> : vector<1xf32>
    %297 = vector.multi_reduction <add>, %296, %cst_133 [1, 2] : vector<1x104x128xf32> to vector<1xf32>
    %298 = vector.shape_cast %297 : vector<1xf32> to vector<1x1x1xf32>
    %299 = vector.extract %298[0, 0, 0] : f32 from vector<1x1x1xf32>
    %c0_i32_134 = arith.constant 0 : i32
    %300 = vector.broadcast %c0_i32_134 : i32 to vector<5x5xi32>
    %301 = arith.cmpi eq, %0, %300 : vector<5x5xi32>
    %c4_i32_135 = arith.constant 4 : i32
    %302 = vector.broadcast %c4_i32_135 : i32 to vector<5x5xi32>
    %303 = arith.cmpi eq, %1, %302 : vector<5x5xi32>
    %304 = arith.andi %301, %303 : vector<5x5xi1>
    %305 = vector.broadcast %299 : f32 to vector<5x5xf32>
    %306 = arith.select %304, %305, %290 : vector<5x5xi1>, vector<5x5xf32>
    %c1_136 = arith.constant 1 : index
    %c0_137 = arith.constant 0 : index
    %c0_138 = arith.constant 0 : index
    %307 = vector.load %arg2[%c1_136, %c0_137, %c0_138] : memref<5x104x128xf32, #tpu.memory_space<vmem>>, vector<1x104x128xf32>
    %308 = vector.shape_cast %307 : vector<1x104x128xf32> to vector<104x128xf32>
    %309 = arith.mulf %292, %308 : vector<104x128xf32>
    %310 = vector.shape_cast %309 : vector<104x128xf32> to vector<1x104x128xf32>
    %cst_139 = arith.constant dense<0.000000e+00> : vector<1xf32>
    %311 = vector.multi_reduction <add>, %310, %cst_139 [1, 2] : vector<1x104x128xf32> to vector<1xf32>
    %312 = vector.shape_cast %311 : vector<1xf32> to vector<1x1x1xf32>
    %313 = vector.extract %312[0, 0, 0] : f32 from vector<1x1x1xf32>
    %c1_i32_140 = arith.constant 1 : i32
    %314 = vector.broadcast %c1_i32_140 : i32 to vector<5x5xi32>
    %315 = arith.cmpi eq, %0, %314 : vector<5x5xi32>
    %c4_i32_141 = arith.constant 4 : i32
    %316 = vector.broadcast %c4_i32_141 : i32 to vector<5x5xi32>
    %317 = arith.cmpi eq, %1, %316 : vector<5x5xi32>
    %318 = arith.andi %315, %317 : vector<5x5xi1>
    %319 = vector.broadcast %313 : f32 to vector<5x5xf32>
    %320 = arith.select %318, %319, %306 : vector<5x5xi1>, vector<5x5xf32>
    %c2_142 = arith.constant 2 : index
    %c0_143 = arith.constant 0 : index
    %c0_144 = arith.constant 0 : index
    %321 = vector.load %arg2[%c2_142, %c0_143, %c0_144] : memref<5x104x128xf32, #tpu.memory_space<vmem>>, vector<1x104x128xf32>
    %322 = vector.shape_cast %321 : vector<1x104x128xf32> to vector<104x128xf32>
    %323 = arith.mulf %292, %322 : vector<104x128xf32>
    %324 = vector.shape_cast %323 : vector<104x128xf32> to vector<1x104x128xf32>
    %cst_145 = arith.constant dense<0.000000e+00> : vector<1xf32>
    %325 = vector.multi_reduction <add>, %324, %cst_145 [1, 2] : vector<1x104x128xf32> to vector<1xf32>
    %326 = vector.shape_cast %325 : vector<1xf32> to vector<1x1x1xf32>
    %327 = vector.extract %326[0, 0, 0] : f32 from vector<1x1x1xf32>
    %c2_i32_146 = arith.constant 2 : i32
    %328 = vector.broadcast %c2_i32_146 : i32 to vector<5x5xi32>
    %329 = arith.cmpi eq, %0, %328 : vector<5x5xi32>
    %c4_i32_147 = arith.constant 4 : i32
    %330 = vector.broadcast %c4_i32_147 : i32 to vector<5x5xi32>
    %331 = arith.cmpi eq, %1, %330 : vector<5x5xi32>
    %332 = arith.andi %329, %331 : vector<5x5xi1>
    %333 = vector.broadcast %327 : f32 to vector<5x5xf32>
    %334 = arith.select %332, %333, %320 : vector<5x5xi1>, vector<5x5xf32>
    %c3_148 = arith.constant 3 : index
    %c0_149 = arith.constant 0 : index
    %c0_150 = arith.constant 0 : index
    %335 = vector.load %arg2[%c3_148, %c0_149, %c0_150] : memref<5x104x128xf32, #tpu.memory_space<vmem>>, vector<1x104x128xf32>
    %336 = vector.shape_cast %335 : vector<1x104x128xf32> to vector<104x128xf32>
    %337 = arith.mulf %292, %336 : vector<104x128xf32>
    %338 = vector.shape_cast %337 : vector<104x128xf32> to vector<1x104x128xf32>
    %cst_151 = arith.constant dense<0.000000e+00> : vector<1xf32>
    %339 = vector.multi_reduction <add>, %338, %cst_151 [1, 2] : vector<1x104x128xf32> to vector<1xf32>
    %340 = vector.shape_cast %339 : vector<1xf32> to vector<1x1x1xf32>
    %341 = vector.extract %340[0, 0, 0] : f32 from vector<1x1x1xf32>
    %c3_i32_152 = arith.constant 3 : i32
    %342 = vector.broadcast %c3_i32_152 : i32 to vector<5x5xi32>
    %343 = arith.cmpi eq, %0, %342 : vector<5x5xi32>
    %c4_i32_153 = arith.constant 4 : i32
    %344 = vector.broadcast %c4_i32_153 : i32 to vector<5x5xi32>
    %345 = arith.cmpi eq, %1, %344 : vector<5x5xi32>
    %346 = arith.andi %343, %345 : vector<5x5xi1>
    %347 = vector.broadcast %341 : f32 to vector<5x5xf32>
    %348 = arith.select %346, %347, %334 : vector<5x5xi1>, vector<5x5xf32>
    %c4_154 = arith.constant 4 : index
    %c0_155 = arith.constant 0 : index
    %c0_156 = arith.constant 0 : index
    %349 = vector.load %arg2[%c4_154, %c0_155, %c0_156] : memref<5x104x128xf32, #tpu.memory_space<vmem>>, vector<1x104x128xf32>
    %350 = vector.shape_cast %349 : vector<1x104x128xf32> to vector<104x128xf32>
    %351 = arith.mulf %292, %350 : vector<104x128xf32>
    %352 = vector.shape_cast %351 : vector<104x128xf32> to vector<1x104x128xf32>
    %cst_157 = arith.constant dense<0.000000e+00> : vector<1xf32>
    %353 = vector.multi_reduction <add>, %352, %cst_157 [1, 2] : vector<1x104x128xf32> to vector<1xf32>
    %354 = vector.shape_cast %353 : vector<1xf32> to vector<1x1x1xf32>
    %355 = vector.extract %354[0, 0, 0] : f32 from vector<1x1x1xf32>
    %c4_i32_158 = arith.constant 4 : i32
    %356 = vector.broadcast %c4_i32_158 : i32 to vector<5x5xi32>
    %357 = arith.cmpi eq, %0, %356 : vector<5x5xi32>
    %c4_i32_159 = arith.constant 4 : i32
    %358 = vector.broadcast %c4_i32_159 : i32 to vector<5x5xi32>
    %359 = arith.cmpi eq, %1, %358 : vector<5x5xi32>
    %360 = arith.andi %357, %359 : vector<5x5xi1>
    %361 = vector.broadcast %355 : f32 to vector<5x5xf32>
    %362 = arith.select %360, %361, %348 : vector<5x5xi1>, vector<5x5xf32>
    %c0_160 = arith.constant 0 : index
    %c0_161 = arith.constant 0 : index
    %c0_162 = arith.constant 0 : index
    %363 = vector.load %arg3[%c0_160, %c0_161, %c0_162] : memref<1x5x5xf32, #tpu.memory_space<vmem>>, vector<1x5x5xf32>
    %364 = vector.shape_cast %363 : vector<1x5x5xf32> to vector<5x5xf32>
    %365 = vector.shape_cast %362 : vector<5x5xf32> to vector<1x5x5xf32>
    tpu.vector_store %arg3[%c0_160, %c0_161, %c0_162], %365 {strides = array<i32>} : memref<1x5x5xf32, #tpu.memory_space<vmem>>, vector<1x5x5xf32>,
    return
  }
  func.func @transform_0(%arg0: i32) -> (i32, i32, i32, i32) {
    %c0_i32 = arith.constant 0 : i32
    %c0_i32_0 = arith.constant 0 : i32
    %c0_i32_1 = arith.constant 0 : i32
    %c0_i32_2 = arith.constant 0 : i32
    return %arg0, %c0_i32, %c0_i32_0, %c0_i32_1 : i32, i32, i32, i32
  }
  func.func @transform_1(%arg0: i32) -> (i32, i32, i32) {
    %c0_i32 = arith.constant 0 : i32
    %c0_i32_0 = arith.constant 0 : i32
    %c0_i32_1 = arith.constant 0 : i32
    %c0_i32_2 = arith.constant 0 : i32
    return %c0_i32, %c0_i32_0, %c0_i32_1 : i32, i32, i32
  }
  func.func @transform_2(%arg0: i32) -> (i32, i32, i32) {
    %c0_i32 = arith.constant 0 : i32
    %c0_i32_0 = arith.constant 0 : i32
    %c0_i32_1 = arith.constant 0 : i32
    return %arg0, %c0_i32, %c0_i32_0 : i32, i32, i32
  }
}

</mosaic_0001>

<bundles_post_ra>
// kernel: single_conv2d_forward.1
= control target key start
LH: loop header
LB: loop body
LE: loop exit
PB: predicated region body
PF: predicated region fallthrough
CT: control target
= control target key end

     0   :  { %s1531_s9 = smov 0   ;;  %s3019_s0 = inlined_call_operand.vmem [shape: f32[2,5,104,128], index: 0, kind: input, shape index: {}]   ;;  %s3020_s1 = inlined_call_operand.vmem [shape: f32[5,104,128], index: 1, kind: input, shape index: {}]   ;;  %s3021_s2 = inlined_call_operand.vmem [shape: f32[2,5,5], index: 2, kind: output, shape index: {}]  }
   0x1 LB: > { %s1274_s10 = sadd.s32 4294967295, %s1514_s9   ;;  %p1278_p0 = scmp.ge.s32.totalorder %s1514_s9, 1  ;;  %s1514_s9 = sphi %s1531_s9, %s12_s9  }
   0x2   : > { %p112_p1 = scmp.lt.s32.totalorder %s1514_s9, 3 }
   0x4   : > { %p113_p2 = pnand %p1278_p0, %p112_p1 }
   0x6   : > { %116 = sbr.rel (%p113_p2) target bundleno = 400 (0x190), region = 28 }
   0xd   : > { %p133_p3 = scmp.lt.s32.totalorder %s1274_s10, 1  ;;  %v1545_v0 = vld [vmem:[%s3020_s1 + $0xd0] sm:$0xff]  ;;  %v1550_v1 = vld [vmem:[%s3020_s1 + $0xd8] sm:$0xff]  ;;  %v1555_v2 = vld [vmem:[%s3020_s1 + $0xe0] sm:$0xff] }
   0xe   : > { %3150 = vst [vmem:[#allocation2_spill] sm:$0xff] %v1545_v0  ;;  %3151 = vst [vmem:[#allocation3_spill] sm:$0xff] %v1550_v1  ;;  %v1565_v3 = vld [vmem:[%s3020_s1 + $0xe8] sm:$0xff]  ;;  %v1588_v11 = vld [vmem:[%s3020_s1] sm:$0xff] }
   0xf   : > { %s3295_s10 = smov (!%p133_p3, %s1274_s10), 1  ;;  %3152 = vst [vmem:[#allocation4_spill] sm:$0xff] %v1555_v2  ;;  %3153 = vst [vmem:[#allocation5_spill] sm:$0xff] %v1565_v3  ;;  %v1593_v12 = vld [vmem:[%s3020_s1 + $0x8] sm:$0xff]  ;;  %v1601_v14 = vld [vmem:[%s3020_s1 + $0xf0] sm:$0xff] }
  0x10   : > { %s1387_s11 = smul.u32 520, %s3295_s10  ;;  %3154 = vst [vmem:[#allocation6_spill] sm:$0xff] %v1588_v11  ;;  %3155 = vst [vmem:[#allocation7_spill] sm:$0xff] %v1593_v12  ;;  %v1608_v17 = vld [vmem:[%s3020_s1 + $0x10] sm:$0xff]  ;;  %v1616_v19 = vld [vmem:[%s3020_s1 + $0xf8] sm:$0xff]  ;;  %s1280_s14 = sshll.u32 %s3295_s10, 3 }
  0x11   : > { %3156 = vst [vmem:[#allocation8_spill] sm:$0xff] %v1601_v14  ;;  %3157 = vst [vmem:[#allocation9_spill] sm:$0xff] %v1608_v17  ;;  %v1625_v22 = vld [vmem:[%s3020_s1 + $0x100] sm:$0xff]  ;;  %v1630_v23 = vld [vmem:[%s3020_s1 + $0x108] sm:$0xff] }
  0x12   : > { %s1560_s20 = scalar_lea.vmem %s3019_s0, %s1387_s11  ;;  %3158 = vst [vmem:[#allocation10_spill] sm:$0xff] %v1616_v19  ;;  %3159 = vst [vmem:[#allocation11_spill] sm:$0xff] %v1625_v22  ;;  %v1637_v26 = vld [vmem:[%s3020_s1 + $0x18] sm:$0xff]  ;;  %v1645_v28 = vld [vmem:[%s3020_s1 + $0x110] sm:$0xff] }
  0x13   : > { %v1568_v4 = vld [vmem:[%s1560_s20] sm:$0xff]  ;;  %v1571_v5 = vld [vmem:[%s1560_s20 + $0x8] sm:$0xff]  ;;  %v1574_v6 = vld [vmem:[%s1560_s20 + $0x10] sm:$0xff]  ;;  %3160 = vst [vmem:[#allocation12_spill] sm:$0xff] %v1630_v23 }
  0x14   : > { %v1577_v7 = vld [vmem:[%s1560_s20 + $0x18] sm:$0xff]  ;;  %v277_v8 = vmul.f32 %v1545_v0, %v1568_v4  ;;  %v278_v9 = vmul.f32 %v1550_v1, %v1571_v5  ;;  %v279_v10 = vmul.f32 %v1555_v2, %v1574_v6  ;;  %v1596_v13 = vld [vmem:[%s1560_s20 + $0x20] sm:$0xff]  ;;  %v1611_v18 = vld [vmem:[%s1560_s20 + $0x28] sm:$0xff]  ;;  %v172_v20 = vmul.f32 %v1588_v11, %v1568_v4  ;;  %3161 = vst [vmem:[#allocation13_spill] sm:$0xff] %v1637_v26 }
  0x15   : > { %v280_v15 = vmul.f32 %v1565_v3, %v1577_v7  ;;  %v173_v21 = vmul.f32 %v1593_v12, %v1571_v5  ;;  %v281_v24 = vmul.f32 %v1601_v14, %v1596_v13  ;;  %v1640_v27 = vld [vmem:[%s1560_s20 + $0x30] sm:$0xff]  ;;  %3162 = vst [vmem:[#allocation14_spill] sm:$0xff] %v1645_v28  ;;  %v1650_v29 = vld [vmem:[%s3020_s1 + $0x118] sm:$0xff]  ;;  %v1655_v30 = vld [vmem:[%s3020_s1 + $0x120] sm:$0xff]  ;;  %v174_v31 = vmul.f32 %v1608_v17, %v1574_v6 }
  0x16   : > { %v290_v16 = vadd.f32 %v278_v9, %v277_v8  ;;  %3163 = vst [vmem:[#allocation15_spill] sm:$0xff] %v1650_v29  ;;  %3164 = vst [vmem:[#allocation16_spill] sm:$0xff] %v1655_v30  ;;  %v1662_v32 = vld [vmem:[%s3020_s1 + $0x138] sm:$0xff]  ;;  %v1667_v33 = vld [vmem:[%s3020_s1 + $0x140] sm:$0xff]  ;;  %v282_v35 = vmul.f32 %v1616_v19, %v1611_v18  ;;  %v175_v42 = vmul.f32 %v1637_v26, %v1577_v7 }
  0x17   : > { %3165 = vst [vmem:[#allocation17_spill] sm:$0xff] %v1662_v32  ;;  %3166 = vst [vmem:[#allocation18_spill] sm:$0xff] %v1667_v33  ;;  %v1670_v34 = vld [vmem:[%s1560_s20 + $0x38] sm:$0xff]  ;;  %v1677_v37 = vld [vmem:[%s3020_s1 + $0x20] sm:$0xff]  ;;  %v185_v43 = vadd.f32 %v173_v21, %v172_v20  ;;  %v329_v44 = vmul.f32 %v1662_v32, %v1568_v4  ;;  %v330_v45 = vmul.f32 %v1667_v33, %v1571_v5 }
  0x18   : > { %v291_v25 = vadd.f32 %v290_v16, %v279_v10  ;;  %3167 = vst [vmem:[#allocation19_spill] sm:$0xff] %v1677_v37  ;;  %v1682_v38 = vld [vmem:[%s3020_s1 + $0x148] sm:$0xff]  ;;  %v1685_v39 = vld [vmem:[%s1560_s20 + $0x40] sm:$0xff]  ;;  %v1691_v41 = vld [vmem:[%s1560_s20 + $0x50] sm:$0xff]  ;;  %v283_v47 = vmul.f32 %v1625_v22, %v1640_v27  ;;  %v284_v52 = vmul.f32 %v1630_v23, %v1670_v34  ;;  %v176_v54 = vmul.f32 %v1677_v37, %v1596_v13 }
  0x19   : > { %3168 = vst [vmem:[#allocation20_spill] sm:$0xff] %v1682_v38  ;;  %v1688_v40 = vld [vmem:[%s1560_s20 + $0x48] sm:$0xff]  ;;  %v1714_v50 = vld [vmem:[%s3020_s1 + $0x150] sm:$0xff]  ;;  %v1717_v51 = vld [vmem:[%s1560_s20 + $0x58] sm:$0xff]  ;;  %v186_v55 = vadd.f32 %v185_v43, %v174_v31  ;;  %v331_v57 = vmul.f32 %v1682_v38, %v1574_v6  ;;  %v285_v59 = vmul.f32 %v1645_v28, %v1685_v39  ;;  %v287_v61 = vmul.f32 %v1655_v30, %v1691_v41 }
  0x1a   : > { %v292_v36 = vadd.f32 %v291_v25, %v280_v15  ;;  %v1702_v46 = vld [vmem:[%s3020_s1 + $0x128] sm:$0xff]  ;;  %3171 = vst [vmem:[#allocation23_spill] sm:$0xff] %v1714_v50  ;;  %v1724_v53 = vld [vmem:[%s3020_s1 + $0x30] sm:$0xff]  ;;  %v1731_v56 = vld [vmem:[%s3020_s1 + $0x158] sm:$0xff]  ;;  %v286_v60 = vmul.f32 %v1650_v29, %v1688_v40  ;;  %v332_v21 = vmul.f32 %v1714_v50, %v1577_v7 }
  0x1b   : > { %3169 = vst [vmem:[#allocation21_spill] sm:$0xff] %v1702_v46  ;;  %v1709_v49 = vld [vmem:[%s3020_s1 + $0x28] sm:$0xff]  ;;  %3172 = vst [vmem:[#allocation24_spill] sm:$0xff] %v1724_v53  ;;  %v1738_v58 = vld [vmem:[%s3020_s1 + $0x130] sm:$0xff]  ;;  %v187_v20 = vadd.f32 %v186_v55, %v175_v42  ;;  %v288_v25 = vmul.f32 %v1702_v46, %v1717_v51  ;;  %v333_v43 = vmul.f32 %v1731_v56, %v1596_v13 }
  0x1c   : > { %v293_v48 = vadd.f32 %v292_v36, %v281_v24  ;;  %3170 = vst [vmem:[#allocation22_spill] sm:$0xff] %v1709_v49  ;;  %3173 = vst [vmem:[#allocation25_spill] sm:$0xff] %v1731_v56  ;;  %v1749_v63 = vld [vmem:[%s3020_s1 + $0x68] sm:$0xff]  ;;  %v1754_v8 = vld [vmem:[%s3020_s1 + $0x70] sm:$0xff]  ;;  %v177_v16 = vmul.f32 %v1709_v49, %v1611_v18  ;;  %v342_v24 = vadd.f32 %v330_v45, %v329_v44 }
  0x1d   : > { %3174 = vst [vmem:[#allocation26_spill] sm:$0xff] %v1738_v58  ;;  %3175 = vst [vmem:[#allocation27_spill] sm:$0xff] %v1749_v63  ;;  %v1757_v9 = vld [vmem:[%s1560_s20 + $0x60] sm:$0xff]  ;;  %v1762_v10 = vld [vmem:[%s3020_s1 + $0x38] sm:$0xff]  ;;  %v226_v56 = vmul.f32 %v1754_v8, %v1571_v5 }
  0x1e   : > { %v294_v62 = vadd.f32 %v293_v48, %v282_v35  ;;  %3176 = vst [vmem:[#allocation28_spill] sm:$0xff] %v1754_v8  ;;  %3177 = vst [vmem:[#allocation29_spill] sm:$0xff] %v1762_v10  ;;  %v1767_v15 = vld [vmem:[%s3020_s1 + $0x40] sm:$0xff]  ;;  %v178_v35 = vmul.f32 %v1724_v53, %v1640_v27  ;;  %v1787_v42 = vld [vmem:[%s3020_s1 + $0x78] sm:$0xff]  ;;  %v343_v55 = vadd.f32 %v342_v24, %v331_v57 }
  0x1f   : > { %3178 = vst [vmem:[#allocation30_spill] sm:$0xff] %v1767_v15  ;;  %v1780_v36 = vld [vmem:[%s3020_s1 + $0x160] sm:$0xff]  ;;  %3180 = vst [vmem:[#allocation32_spill] sm:$0xff] %v1787_v42  ;;  %v1792_v44 = vld [vmem:[%s3020_s1 + $0x48] sm:$0xff]  ;;  %v289_v50 = vmul.f32 %v1738_v58, %v1757_v9  ;;  %v179_v46 = vmul.f32 %v1762_v10, %v1670_v34  ;;  %v227_v32 = vmul.f32 %v1787_v42, %v1574_v6 }
  0x20   : > { %v295_v31 = vadd.f32 %v294_v62, %v283_v47  ;;  %3179 = vst [vmem:[#allocation31_spill] sm:$0xff] %v1780_v36  ;;  %3181 = vst [vmem:[#allocation33_spill] sm:$0xff] %v1792_v44  ;;  %v1797_v45 = vld [vmem:[%s3020_s1 + $0x50] sm:$0xff]  ;;  %v188_v47 = vadd.f32 %v187_v20, %v176_v54  ;;  %v1802_v48 = vld [vmem:[%s3020_s1 + $0x168] sm:$0xff]  ;;  %v225_v62 = vmul.f32 %v1749_v63, %v1568_v4 }
  0x21   : > { %3182 = vst [vmem:[#allocation34_spill] sm:$0xff] %v1797_v45  ;;  %3183 = vst [vmem:[#allocation35_spill] sm:$0xff] %v1802_v48  ;;  %v180_v54 = vmul.f32 %v1767_v15, %v1685_v39  ;;  %v1817_v57 = vld [vmem:[%s3020_s1 + $0x80] sm:$0xff]  ;;  %v1822_v20 = vld [vmem:[%s3020_s1 + $0x58] sm:$0xff]  ;;  %v334_v58 = vmul.f32 %v1780_v36, %v1611_v18  ;;  %v344_v33 = vadd.f32 %v343_v55, %v332_v21 }
  0x22   : > { %v296_v38 = vadd.f32 %v295_v31, %v284_v52  ;;  %3184 = vst [vmem:[#allocation36_spill] sm:$0xff] %v1817_v57  ;;  %3185 = vst [vmem:[#allocation37_spill] sm:$0xff] %v1822_v20  ;;  %v1827_v52 = vld [vmem:[%s3020_s1 + $0x60] sm:$0xff]  ;;  %v189_v24 = vadd.f32 %v188_v47, %v177_v16  ;;  %v1832_v31 = vld [vmem:[%s3020_s1 + $0x170] sm:$0xff]  ;;  %v181_v29 = vmul.f32 %v1792_v44, %v1688_v40 }
  0x23   : > { %3186 = vst [vmem:[#allocation38_spill] sm:$0xff] %v1827_v52  ;;  %3187 = vst [vmem:[#allocation39_spill] sm:$0xff] %v1832_v31  ;;  %v182_v16 = vmul.f32 %v1797_v45, %v1691_v41  ;;  %v335_v47 = vmul.f32 %v1802_v48, %v1640_v27  ;;  %v1847_v28 = vld [vmem:[%s3020_s1 + $0x88] sm:$0xff]  ;;  %v1852_v21 = vld [vmem:[%s3020_s1 + $0x178] sm:$0xff]  ;;  %v238_v55 = vadd.f32 %v226_v56, %v225_v62 }
  0x24   : > { %v297_v30 = vadd.f32 %v296_v38, %v285_v59  ;;  %3188 = vst [vmem:[#allocation40_spill] sm:$0xff] %v1847_v28  ;;  %v190_v36 = vadd.f32 %v189_v24, %v178_v35  ;;  %3189 = vst [vmem:[#allocation41_spill] sm:$0xff] %v1852_v21  ;;  %v345_v38 = vadd.f32 %v344_v33, %v333_v43  ;;  %v1857_v23 = vld [vmem:[%s1560_s20 + $0x68] sm:$0xff]  ;;  %v1860_v48 = vld [vmem:[%s1560_s20 + $0x70] sm:$0xff] }
  0x25   : > { %v228_v59 = vmul.f32 %v1817_v57, %v1577_v7  ;;  %v183_v42 = vmul.f32 %v1822_v20, %v1717_v51  ;;  %v1866_v35 = vmul.f32 %v1827_v52, %v1757_v9  ;;  %v336_v33 = vmul.f32 %v1832_v31, %v1670_v34  ;;  %v1873_v43 = vld [vmem:[%s3020_s1 + $0x90] sm:$0xff]  ;;  %v1888_v57 = vld [vmem:[%s1560_s20 + $0x78] sm:$0xff] }
  0x26   : > { %v298_v22 = vadd.f32 %v297_v30, %v286_v60  ;;  %3190 = vst [vmem:[#allocation42_spill] sm:$0xff] %v1873_v43  ;;  %v191_v56 = vadd.f32 %v190_v36, %v179_v46  ;;  %v1878_v30 = vld [vmem:[%s3020_s1 + $0x180] sm:$0xff]  ;;  %v1883_v60 = vld [vmem:[%s3020_s1 + $0x188] sm:$0xff]  ;;  %v346_v62 = vadd.f32 %v345_v38, %v334_v58  ;;  %v229_v24 = vmul.f32 %v1847_v28, %v1596_v13  ;;  %v1895_v36 = vld [vmem:[%s3020_s1 + $0x98] sm:$0xff] }
  0x27   : > { %3191 = vst [vmem:[#allocation43_spill] sm:$0xff] %v1878_v30  ;;  %3192 = vst [vmem:[#allocation44_spill] sm:$0xff] %v1883_v60  ;;  %v239_v31 = vadd.f32 %v238_v55, %v227_v32  ;;  %v337_v46 = vmul.f32 %v1852_v21, %v1685_v39  ;;  %v433_v52 = vmul.f32 %v1857_v23, %v1588_v11  ;;  %v1909_v21 = vld [vmem:[%s1560_s20 + $0x80] sm:$0xff] }
  0x28   : > { %v299_v19 = vadd.f32 %v298_v22, %v287_v61  ;;  %3193 = vst [vmem:[#allocation45_spill] sm:$0xff] %v1895_v36  ;;  %v434_v58 = vmul.f32 %v1860_v48, %v1593_v12  ;;  %v192_v38 = vadd.f32 %v191_v56, %v180_v54  ;;  %v1904_v22 = vld [vmem:[%s3020_s1 + $0x190] sm:$0xff]  ;;  %v347_v32 = vadd.f32 %v346_v62, %v335_v47  ;;  %v1918_v54 = vld [vmem:[%s3020_s1 + $0xa0] sm:$0xff] }
  0x29   : > { %3194 = vst [vmem:[#allocation46_spill] sm:$0xff] %v1904_v22  ;;  %v230_v61 = vmul.f32 %v1873_v43, %v1611_v18  ;;  %v240_v55 = vadd.f32 %v239_v31, %v228_v59  ;;  %v338_v11 = vmul.f32 %v1878_v30, %v1688_v40  ;;  %v339_v12 = vmul.f32 %v1883_v60, %v1691_v41  ;;  %v1925_v31 = vld [vmem:[%s1560_s20 + $0x88] sm:$0xff]  ;;  %v1930_v59 = vld [vmem:[%s3020_s1 + $0x1a0] sm:$0xff]  ;;  %v1954_v30 = vld [vmem:[%s1560_s20 + $0x90] sm:$0xff] }
  0x2a   : > { %v300_v28 = vadd.f32 %v299_v19, %v288_v25  ;;  %3195 = vst [vmem:[#allocation47_spill] sm:$0xff] %v1918_v54  ;;  %v435_v47 = vmul.f32 %v1888_v57, %v1608_v17  ;;  %v193_v56 = vadd.f32 %v192_v38, %v181_v29  ;;  %v348_v62 = vadd.f32 %v347_v32, %v336_v33  ;;  %v1935_v60 = vld [vmem:[%s3020_s1 + $0x1a8] sm:$0xff] }
  0x2b   : > { %v231_v19 = vmul.f32 %v1895_v36, %v1640_v27  ;;  %v241_v25 = vadd.f32 %v240_v55, %v229_v24  ;;  %3196 = vst [vmem:[#allocation48_spill] sm:$0xff] %v1930_v59  ;;  %3197 = vst [vmem:[#allocation49_spill] sm:$0xff] %v1935_v60  ;;  %v340_v29 = vmul.f32 %v1904_v22, %v1717_v51  ;;  %v1942_v33 = vld [vmem:[%s3020_s1 + $0xa8] sm:$0xff]  ;;  %v1949_v55 = vld [vmem:[%s3020_s1 + $0x198] sm:$0xff] }
  0x2c   : > { %v301_v17 = vadd.f32 %v300_v28, %v289_v50  ;;  %3198 = vst [vmem:[#allocation50_spill] sm:$0xff] %v1942_v33  ;;  %v436_v24 = vmul.f32 %v1909_v21, %v1637_v26  ;;  %v446_v38 = vadd.f32 %v434_v58, %v433_v52  ;;  %v194_v32 = vadd.f32 %v193_v56, %v182_v16  ;;  %v1959_v36 = vld [vmem:[%s3020_s1 + $0x1b0] sm:$0xff]  ;;  %v1975_v26 = vld [vmem:[%s1560_s20 + $0x98] sm:$0xff] }
  0x2d   : > { %3199 = vst [vmem:[#allocation51_spill] sm:$0xff] %v1949_v55  ;;  %v349_v28 = vadd.f32 %v348_v62, %v337_v46  ;;  %v232_v50 = vmul.f32 %v1918_v54, %v1670_v34  ;;  %v242_v22 = vadd.f32 %v241_v25, %v230_v61  ;;  %3200 = vst [vmem:[#allocation52_spill] sm:$0xff] %v1959_v36  ;;  %v1964_v52 = vld [vmem:[%s3020_s1 + $0xb0] sm:$0xff] }
  0x2e   : > { %302 = vadd.xlane.f32.xlu1 %v301_v17  ;;  %3201 = vst [vmem:[#allocation53_spill] sm:$0xff] %v1964_v52  ;;  %v437_v16 = vmul.f32 %v1925_v31, %v1677_v37  ;;  %v447_v46 = vadd.f32 %v446_v38, %v435_v47  ;;  %v381_v58 = vmul.f32 %v1930_v59, %v1568_v4  ;;  %v1980_v37 = vld [vmem:[%s3020_s1 + $0x1b8] sm:$0xff] }
  0x2f   : > { %v382_v61 = vmul.f32 %v1935_v60, %v1571_v5  ;;  %v195_v56 = vadd.f32 %v194_v32, %v183_v42  ;;  %v350_v62 = vadd.f32 %v349_v28, %v338_v11  ;;  %v233_v17 = vmul.f32 %v1942_v33, %v1685_v39  ;;  %v1987_v5 = vld [vmem:[%s3020_s1 + $0xb8] sm:$0xff]  ;;  %v1992_v11 = vld [vmem:[%s3020_s1 + $0xc0] sm:$0xff] }
  0x30   : > { %v243_v25 = vadd.f32 %v242_v22, %v231_v19  ;;  %v341_v4 = vmul.f32 %v1949_v55, %v1757_v9  ;;  %3202 = vst [vmem:[#allocation54_spill] sm:$0xff] %v1987_v5  ;;  %3203 = vst [vmem:[#allocation55_spill] sm:$0xff] %v1992_v11  ;;  %v438_v42 = vmul.f32 %v1954_v30, %v1709_v49  ;;  %v2002_v55 = vld [vmem:[%s1560_s20 + $0xa0] sm:$0xff] }
  0x31   : > { %v448_v22 = vadd.f32 %v447_v46, %v436_v24  ;;  %v383_v47 = vmul.f32 %v1959_v36, %v1574_v6  ;;  %v196_v19 = vadd.f32 %v195_v56, %v1866_v35  ;;  %v351_v38 = vadd.f32 %v350_v62, %v339_v12  ;;  %v2007_v33 = vld [vmem:[%s3020_s1 + $0x1c0] sm:$0xff] }
  0x32   : > { %v234_v32 = vmul.f32 %v1964_v52, %v1688_v40  ;;  %v244_v28 = vadd.f32 %v243_v25, %v232_v50  ;;  %3204 = vst [vmem:[#allocation56_spill] sm:$0xff] %v2007_v33  ;;  %v439_v24 = vmul.f32 %v1975_v26, %v1724_v53  ;;  %v384_v35 = vmul.f32 %v1980_v37, %v1577_v7  ;;  %v2018_v25 = vld [vmem:[%s1560_s20 + $0xa8] sm:$0xff]  ;;  %v2043_v53 = vld [vmem:[%s3020_s1 + $0x1d0] sm:$0xff] }
  0x33   : > { %v449_v6 = vadd.f32 %v448_v22, %v437_v16  ;;  %v394_v12 = vadd.f32 %v382_v61, %v381_v58  ;;  %197 = vadd.xlane.f32.xlu0 %v196_v19  ;;  %v352_v46 = vadd.f32 %v351_v38, %v340_v29  ;;  %v235_v50 = vmul.f32 %v1987_v5, %v1691_v41  ;;  %v2023_v16 = vld [vmem:[%s3020_s1 + $0x1c8] sm:$0xff]  ;;  %v2031_v29 = vld [vmem:[%s1560_s20 + $0xb0] sm:$0xff] }
  0x34   : > { %v236_v56 = vmul.f32 %v1992_v11, %v1717_v51  ;;  %v245_v62 = vadd.f32 %v244_v28, %v233_v17  ;;  %3205 = vst [vmem:[#allocation57_spill] sm:$0xff] %v2023_v16  ;;  %v2028_v7 = vld [vmem:[%s3020_s1 + $0xc8] sm:$0xff]  ;;  %v440_v58 = vmul.f32 %v2002_v55, %v1762_v10  ;;  %v385_v17 = vmul.f32 %v2007_v33, %v1596_v13  ;;  %v2038_v28 = vld [vmem:[%s1560_s20 + $0xb8] sm:$0xff] }
  0x35   : > { %3206 = vst [vmem:[#allocation58_spill] sm:$0xff] %v2028_v7  ;;  %v450_v61 = vadd.f32 %v449_v6, %v438_v42  ;;  %v395_v22 = vadd.f32 %v394_v12, %v383_v47  ;;  %v353_v19 = vadd.f32 %v352_v46, %v341_v4  ;;  %3207 = vst [vmem:[#allocation59_spill] sm:$0xff] %v2043_v53  ;;  %v2050_v42 = vld [vmem:[%s1560_s20 + $0xc0] sm:$0xff] }
  0x36   : > { %v246_v38 = vadd.f32 %v245_v62, %v234_v32  ;;  %v508_v49 = vmul.f32 %v1857_v23, %v1545_v0  ;;  %v509_v10 = vmul.f32 %v1860_v48, %v1550_v1  ;;  %v441_v13 = vmul.f32 %v2018_v25, %v1767_v15  ;;  %v2063_v62 = vld [vmem:[%s3020_s1 + $0x1d8] sm:$0xff] }
  0x37   : > { %v451_v4 = vadd.f32 %v450_v61, %v439_v24  ;;  %v386_v47 = vmul.f32 %v2023_v16, %v1611_v18  ;;  %v396_v32 = vadd.f32 %v395_v22, %v384_v35  ;;  %354 = vadd.xlane.f32.xlu1 %v353_v19  ;;  %v237_v6 = vmul.f32 %v2028_v7, %v1757_v9  ;;  %v2072_v19 = vld [vmem:[%s1560_s20 + $0xc8] sm:$0xff] }
  0x38   : > { %v247_v12 = vadd.f32 %v246_v38, %v235_v50  ;;  %v442_v46 = vmul.f32 %v2031_v29, %v1792_v44  ;;  %3208 = vst [vmem:[#allocation60_spill] sm:$0xff] %v2063_v62  ;;  %v510_v24 = vmul.f32 %v1888_v57, %v1555_v2  ;;  %v443_v18 = vmul.f32 %v2038_v28, %v1797_v45  ;;  %v2079_v44 = vld [vmem:[%s3020_s1 + $0x1e0] sm:$0xff] }
  0x39   : > { %v452_v35 = vadd.f32 %v451_v4, %v440_v58  ;;  %v387_v61 = vmul.f32 %v2043_v53, %v1640_v27  ;;  %v397_v22 = vadd.f32 %v396_v32, %v385_v17  ;;  %v444_v38 = vmul.f32 %v2050_v42, %v1822_v20  ;;  %3209 = vst [vmem:[#allocation61_spill] sm:$0xff] %v2079_v44  ;;  %v2086_v27 = vld [vmem:[%s3020_s1 + $0x1e8] sm:$0xff]  ;;  %v3214_v20 = vld [vmem:[#allocation10_spill] sm:$0xff] }
  0x3a   : > { %v248_v50 = vadd.f32 %v247_v12, %v236_v56  ;;  %v511_v2 = vmul.f32 %v1909_v21, %v1565_v3  ;;  %v521_v45 = vadd.f32 %v509_v10, %v508_v49  ;;  %3210 = vst [vmem:[#allocation62_spill] sm:$0xff] %v2086_v27  ;;  %v388_v56 = vmul.f32 %v2063_v62, %v1670_v34  ;;  %v2095_v12 = vld [vmem:[%s3020_s1 + $0x1f0] sm:$0xff]  ;;  %v2100_v49 = vld [vmem:[%s3020_s1 + $0x1f8] sm:$0xff] }
  0x3b   : > { %v453_v58 = vadd.f32 %v452_v35, %v441_v13  ;;  %v398_v17 = vadd.f32 %v397_v22, %v386_v47  ;;  %v512_v4 = vmul.f32 %v1925_v31, %v1601_v14  ;;  %3211 = vst [vmem:[#allocation63_spill] sm:$0xff] %v2095_v12  ;;  %3212 = vst [vmem:[#allocation64_spill] sm:$0xff] %v2100_v49  ;;  %v3213_v47 = vld [vmem:[#allocation38_spill] sm:$0xff]  ;;  %v3215_v3 = vld [vmem:[#allocation32_spill] sm:$0xff] }
  0x3c   : > { %v249_v32 = vadd.f32 %v248_v50, %v237_v6  ;;  %v522_v10 = vadd.f32 %v521_v45, %v510_v24  ;;  %v471_v13 = vmul.f32 %v1857_v23, %v1749_v63  ;;  %v472_v34 = vmul.f32 %v1860_v48, %v1754_v8 }
  0x3d   : > { %v445_v6 = vmul.f32 %v2072_v19, %v3213_v47  ;;  %v454_v35 = vadd.f32 %v453_v58, %v442_v46  ;;  %v389_v22 = vmul.f32 %v2079_v44, %v1685_v39  ;;  %v399_v50 = vadd.f32 %v398_v17, %v387_v61  ;;  %v2123_v61 = vld [vmem:[%s3020_s1 + $0x200] sm:$0xff]  ;;  %v3218_v17 = vld [vmem:[#allocation36_spill] sm:$0xff] }
  0x3e   : > { %250 = vadd.xlane.f32.xlu0 %v249_v32  ;;  %v390_v14 = vmul.f32 %v2086_v27, %v1688_v40  ;;  %v513_v45 = vmul.f32 %v1954_v30, %v3214_v20  ;;  %v523_v24 = vadd.f32 %v522_v10, %v511_v2  ;;  %v473_v15 = vmul.f32 %v1888_v57, %v3215_v3  ;;  %v3217_v40 = vld [vmem:[#allocation11_spill] sm:$0xff] }
  0x3f   : > { %v455_v1 = vadd.f32 %v454_v35, %v443_v18  ;;  %v391_v47 = vmul.f32 %v2095_v12, %v1691_v41  ;;  %v392_v46 = vmul.f32 %v2100_v49, %v1717_v51  ;;  %v400_v39 = vadd.f32 %v399_v50, %v388_v56  ;;  %3216 = vst [vmem:[#allocation65_spill] sm:$0xff] %v2123_v61  ;;  %v3219_v41 = vld [vmem:[#allocation12_spill] sm:$0xff] }
  0x40   : > { %v514_v58 = vmul.f32 %v1975_v26, %v3217_v40  ;;  %v524_v2 = vadd.f32 %v523_v24, %v512_v4  ;;  %v474_v32 = vmul.f32 %v1909_v21, %v3218_v17  ;;  %v484_v18 = vadd.f32 %v472_v34, %v471_v13  ;;  %v3220_v51 = vld [vmem:[#allocation40_spill] sm:$0xff] }
  0x41   : > { %v456_v10 = vadd.f32 %v455_v1, %v444_v38  ;;  %v401_v35 = vadd.f32 %v400_v39, %v389_v22  ;;  %v515_v20 = vmul.f32 %v2002_v55, %v3219_v41  ;;  %v475_v56 = vmul.f32 %v1925_v31, %v3220_v51  ;;  %v3221_v38 = vld [vmem:[#allocation14_spill] sm:$0xff] }
  0x42   : > { %v525_v50 = vadd.f32 %v524_v2, %v513_v45  ;;  %v485_v0 = vadd.f32 %v484_v18, %v473_v15  ;;  %v582_v49 = vmul.f32 %v1857_v23, %v1930_v59  ;;  %v583_v4 = vmul.f32 %v1860_v48, %v1935_v60  ;;  %v3222_v18 = vld [vmem:[#allocation15_spill] sm:$0xff]  ;;  %v3226_v59 = vld [vmem:[#allocation18_spill] sm:$0xff] }
  0x43   : > { %v457_v24 = vadd.f32 %v456_v10, %v445_v6  ;;  %v393_v13 = vmul.f32 %v2123_v61, %v1757_v9  ;;  %v402_v1 = vadd.f32 %v401_v35, %v390_v14  ;;  %v516_v34 = vmul.f32 %v2018_v25, %v3221_v38  ;;  %v3223_v10 = vld [vmem:[#allocation16_spill] sm:$0xff]  ;;  %v3224_v14 = vld [vmem:[#allocation45_spill] sm:$0xff] }
  0x44   : > { %v526_v22 = vadd.f32 %v525_v50, %v514_v58  ;;  %v476_v39 = vmul.f32 %v1954_v30, %v1873_v43  ;;  %v486_v45 = vadd.f32 %v485_v0, %v474_v32  ;;  %v584_v15 = vmul.f32 %v1888_v57, %v1959_v36 }
  0x45   : > { %458 = vadd.xlane.f32.xlu1 %v457_v24  ;;  %v403_v2 = vadd.f32 %v402_v1, %v391_v47  ;;  %v517_v6 = vmul.f32 %v2031_v29, %v3222_v18  ;;  %v518_v9 = vmul.f32 %v2038_v28, %v3223_v10  ;;  %v477_v35 = vmul.f32 %v1975_v26, %v3224_v14  ;;  %v3225_v1 = vld [vmem:[#allocation17_spill] sm:$0xff] }
  0x46   : > { %v527_v38 = vadd.f32 %v526_v22, %v515_v20  ;;  %v487_v58 = vadd.f32 %v486_v45, %v475_v56  ;;  %v585_v50 = vmul.f32 %v1909_v21, %v1980_v37  ;;  %v595_v0 = vadd.f32 %v583_v4, %v582_v49  ;;  %v3227_v22 = vld [vmem:[#allocation21_spill] sm:$0xff] }
  0x47   : > { %v404_v32 = vadd.f32 %v403_v2, %v392_v46  ;;  %v478_v24 = vmul.f32 %v2002_v55, %v1918_v54  ;;  %v586_v47 = vmul.f32 %v1925_v31, %v2007_v33  ;;  %v545_v36 = vmul.f32 %v1857_v23, %v3225_v1  ;;  %v3228_v46 = vld [vmem:[#allocation50_spill] sm:$0xff] }
  0x48   : > { %v528_v10 = vadd.f32 %v527_v38, %v516_v34  ;;  %v488_v18 = vadd.f32 %v487_v58, %v476_v39  ;;  %v596_v60 = vadd.f32 %v595_v0, %v584_v15  ;;  %v546_v20 = vmul.f32 %v1860_v48, %v3226_v59  ;;  %v3229_v34 = vld [vmem:[#allocation20_spill] sm:$0xff]  ;;  %v3230_v48 = vld [vmem:[#allocation26_spill] sm:$0xff]  ;;  %v3231_v0 = vld [vmem:[#allocation23_spill] sm:$0xff] }
  0x49   : > { %v405_v56 = vadd.f32 %v404_v32, %v393_v13  ;;  %v519_v49 = vmul.f32 %v2050_v42, %v3227_v22  ;;  %v479_v4 = vmul.f32 %v2018_v25, %v3228_v46  ;;  %v587_v45 = vmul.f32 %v1954_v30, %v2023_v16  ;;  %v3232_v16 = vld [vmem:[#allocation25_spill] sm:$0xff] }
  0x4a   : > { %v529_v2 = vadd.f32 %v528_v10, %v517_v6  ;;  %v489_v23 = vadd.f32 %v488_v18, %v477_v35  ;;  %v597_v38 = vadd.f32 %v596_v60, %v585_v50  ;;  %v547_v39 = vmul.f32 %v1888_v57, %v3229_v34  ;;  %v2178_v35 = vld [vmem:[%s1560_s20 + $0xd0] sm:$0xff]  ;;  %v2181_v57 = vld [vmem:[%s1560_s20 + $0xd8] sm:$0xff] }
  0x4b   : > { %406 = vadd.xlane.f32.xlu0 %v405_v56  ;;  %v520_v13 = vmul.f32 %v2072_v19, %v3230_v48  ;;  %v480_v15 = vmul.f32 %v2031_v29, %v1964_v52  ;;  %v588_v58 = vmul.f32 %v1975_v26, %v2043_v53  ;;  %v548_v32 = vmul.f32 %v1909_v21, %v3231_v0 }
  0x4c   : > { %v530_v6 = vadd.f32 %v529_v2, %v518_v9  ;;  %v490_v18 = vadd.f32 %v489_v23, %v478_v24  ;;  %v598_v60 = vadd.f32 %v597_v38, %v586_v47  ;;  %v558_v10 = vadd.f32 %v546_v20, %v545_v36  ;;  %v2192_v20 = vld [vmem:[%s1560_s20 + $0xe0] sm:$0xff]  ;;  %v3233_v23 = vld [vmem:[#allocation31_spill] sm:$0xff] }
  0x4d   : > { %v481_v50 = vmul.f32 %v2038_v28, %v1987_v5  ;;  %v482_v56 = vmul.f32 %v2050_v42, %v1992_v11  ;;  %v589_v53 = vmul.f32 %v2002_v55, %v2063_v62  ;;  %v549_v21 = vmul.f32 %v1925_v31, %v3232_v16 }
  0x4e   : > { %v531_v9 = vadd.f32 %v530_v6, %v519_v49  ;;  %v491_v24 = vadd.f32 %v490_v18, %v479_v4  ;;  %v599_v36 = vadd.f32 %v598_v60, %v587_v45  ;;  %v559_v47 = vadd.f32 %v558_v10, %v547_v39  ;;  %v2203_v39 = vld [vmem:[%s1560_s20 + $0xe8] sm:$0xff] }
  0x4f   : > { %v590_v2 = vmul.f32 %v2018_v25, %v2079_v44  ;;  %v550_v38 = vmul.f32 %v1954_v30, %v3233_v23  ;;  %v671_v48 = vmul.f32 %v2178_v35, %v1749_v63  ;;  %v672_v62 = vmul.f32 %v2181_v57, %v1754_v8 }
  0x50   : > { %v532_v31 = vadd.f32 %v531_v9, %v520_v13  ;;  %v492_v49 = vadd.f32 %v491_v24, %v480_v15  ;;  %v600_v4 = vadd.f32 %v599_v36, %v588_v58  ;;  %v560_v45 = vadd.f32 %v559_v47, %v548_v32  ;;  %v3234_v58 = vld [vmem:[#allocation35_spill] sm:$0xff]  ;;  %v2216_v9 = vld [vmem:[%s1560_s20 + $0xf0] sm:$0xff] }
  0x51   : > { %v483_v6 = vmul.f32 %v2072_v19, %v2028_v7  ;;  %v591_v18 = vmul.f32 %v2031_v29, %v2086_v27  ;;  %v592_v30 = vmul.f32 %v2038_v28, %v2095_v12  ;;  %v673_v60 = vmul.f32 %v2192_v20, %v3215_v3  ;;  %v3235_v24 = vld [vmem:[#allocation64_spill] sm:$0xff]  ;;  %v3238_v3 = vld [vmem:[#allocation7_spill] sm:$0xff] }
  0x52   : > { %533 = vadd.xlane.f32.xlu1 %v532_v31  ;;  %v493_v13 = vadd.f32 %v492_v49, %v481_v50  ;;  %v601_v15 = vadd.f32 %v600_v4, %v589_v53  ;;  %v551_v32 = vmul.f32 %v1975_v26, %v3234_v58  ;;  %v561_v10 = vadd.f32 %v560_v45, %v549_v21  ;;  %v3236_v31 = vld [vmem:[#allocation39_spill] sm:$0xff]  ;;  %v2227_v49 = vld [vmem:[%s1560_s20 + $0xf8] sm:$0xff] }
  0x53   : > { %v593_v36 = vmul.f32 %v2050_v42, %v3235_v24  ;;  %v594_v47 = vmul.f32 %v2072_v19, %v2123_v61  ;;  %v674_v12 = vmul.f32 %v2203_v39, %v3218_v17  ;;  %v684_v27 = vadd.f32 %v672_v62, %v671_v48  ;;  %v3237_v24 = vld [vmem:[#allocation6_spill] sm:$0xff] }
  0x54   : > { %v494_v50 = vadd.f32 %v493_v13, %v482_v56  ;;  %v602_v53 = vadd.f32 %v601_v15, %v590_v2  ;;  %v552_v26 = vmul.f32 %v2002_v55, %v3236_v31  ;;  %v562_v21 = vadd.f32 %v561_v10, %v550_v38  ;;  %v3239_v56 = vld [vmem:[#allocation41_spill] sm:$0xff]  ;;  %v2238_v38 = vld [vmem:[%s1560_s20 + $0x100] sm:$0xff]  ;;  %v3240_v13 = vld [vmem:[#allocation43_spill] sm:$0xff] }
  0x55   : > { %v675_v4 = vmul.f32 %v2216_v9, %v3220_v51  ;;  %v685_v45 = vadd.f32 %v684_v27, %v673_v60  ;;  %v633_v61 = vmul.f32 %v2178_v35, %v3237_v24  ;;  %v634_v17 = vmul.f32 %v2181_v57, %v3238_v3  ;;  %v2243_v10 = vld [vmem:[%s1560_s20 + $0x108] sm:$0xff]  ;;  %v3241_v51 = vld [vmem:[#allocation9_spill] sm:$0xff] }
  0x56   : > { %v495_v62 = vadd.f32 %v494_v50, %v483_v6  ;;  %v603_v48 = vadd.f32 %v602_v53, %v591_v18  ;;  %v553_v2 = vmul.f32 %v2018_v25, %v3239_v56  ;;  %v563_v55 = vadd.f32 %v562_v21, %v551_v32  ;;  %v3242_v25 = vld [vmem:[#allocation44_spill] sm:$0xff]  ;;  %v3243_v50 = vld [vmem:[#allocation46_spill] sm:$0xff] }
  0x57   : > { %v554_v15 = vmul.f32 %v2031_v29, %v3240_v13  ;;  %v676_v27 = vmul.f32 %v2227_v49, %v1873_v43  ;;  %v686_v60 = vadd.f32 %v685_v45, %v674_v12  ;;  %v635_v6 = vmul.f32 %v2192_v20, %v3241_v51  ;;  %v2254_v21 = vld [vmem:[%s1560_s20 + $0x110] sm:$0xff]  ;;  %v3244_v45 = vld [vmem:[#allocation13_spill] sm:$0xff] }
  0x58   : > { %496 = vadd.xlane.f32.xlu0 %v495_v62  ;;  %v604_v18 = vadd.f32 %v603_v48, %v592_v30  ;;  %v555_v32 = vmul.f32 %v2038_v28, %v3242_v25  ;;  %v556_v53 = vmul.f32 %v2050_v42, %v3243_v50  ;;  %v564_v29 = vadd.f32 %v563_v55, %v552_v26  ;;  %v3245_v28 = vld [vmem:[#allocation19_spill] sm:$0xff]  ;;  %v2265_v42 = vld [vmem:[%s1560_s20 + $0x118] sm:$0xff]  ;;  %v2268_v26 = vld [vmem:[%s1560_s20 + $0x120] sm:$0xff] }
  0x59   : > { %v677_v43 = vmul.f32 %v2238_v38, %v3224_v14  ;;  %v687_v12 = vadd.f32 %v686_v60, %v675_v4  ;;  %v636_v44 = vmul.f32 %v2203_v39, %v3244_v45  ;;  %v646_v8 = vadd.f32 %v634_v17, %v633_v61 }
  0x5a   : > { %v605_v63 = vadd.f32 %v604_v18, %v593_v36  ;;  %v565_v62 = vadd.f32 %v564_v29, %v553_v2  ;;  %v678_v30 = vmul.f32 %v2243_v10, %v1918_v54  ;;  %v637_v48 = vmul.f32 %v2216_v9, %v3245_v28  ;;  %v3246_v36 = vld [vmem:[#allocation51_spill] sm:$0xff]  ;;  %v3247_v54 = vld [vmem:[#allocation22_spill] sm:$0xff] }
  0x5b   : > { %v688_v55 = vadd.f32 %v687_v12, %v676_v27  ;;  %v647_v33 = vadd.f32 %v646_v8, %v635_v6  ;;  %v745_v4 = vmul.f32 %v2178_v35, %v3225_v1  ;;  %v746_v61 = vmul.f32 %v2181_v57, %v3226_v59 }
  0x5c   : > { %v606_v17 = vadd.f32 %v605_v63, %v594_v47  ;;  %v557_v2 = vmul.f32 %v2072_v19, %v3246_v36  ;;  %v566_v60 = vadd.f32 %v565_v62, %v554_v15  ;;  %v679_v18 = vmul.f32 %v2254_v21, %v3228_v46  ;;  %v3248_v19 = vld [vmem:[#allocation24_spill] sm:$0xff]  ;;  %v3249_v62 = vld [vmem:[#allocation29_spill] sm:$0xff] }
  0x5d   : > { %v689_v29 = vadd.f32 %v688_v55, %v677_v43  ;;  %v638_v27 = vmul.f32 %v2227_v49, %v3247_v54  ;;  %v648_v8 = vadd.f32 %v647_v33, %v636_v44  ;;  %v747_v1 = vmul.f32 %v2192_v20, %v3229_v34  ;;  %v2289_v43 = vld [vmem:[%s1560_s20 + $0x128] sm:$0xff] }
  0x5e   : > { %607 = vadd.xlane.f32.xlu1 %v606_v17  ;;  %v567_v6 = vadd.f32 %v566_v60, %v555_v32  ;;  %v680_v63 = vmul.f32 %v2265_v42, %v1964_v52  ;;  %v681_v59 = vmul.f32 %v2268_v26, %v1987_v5  ;;  %v639_v47 = vmul.f32 %v2238_v38, %v3248_v19  ;;  %v3250_v17 = vld [vmem:[#allocation2_spill] sm:$0xff]  ;;  %v2300_v5 = vld [vmem:[%s1560_s20 + $0x130] sm:$0xff] }
  0x5f   : > { %v690_v15 = vadd.f32 %v689_v29, %v678_v30  ;;  %v649_v12 = vadd.f32 %v648_v8, %v637_v48  ;;  %v748_v44 = vmul.f32 %v2203_v39, %v3231_v0  ;;  %v758_v33 = vadd.f32 %v746_v61, %v745_v4  ;;  %v3251_v48 = vld [vmem:[#allocation3_spill] sm:$0xff]  ;;  %v3252_v4 = vld [vmem:[#allocation30_spill] sm:$0xff] }
  0x60   : > { %v568_v34 = vadd.f32 %v567_v6, %v556_v53  ;;  %v640_v32 = vmul.f32 %v2243_v10, %v3249_v62  ;;  %v749_v55 = vmul.f32 %v2216_v9, %v3232_v16  ;;  %v708_v60 = vmul.f32 %v2178_v35, %v3250_v17 }
  0x61   : > { %v691_v52 = vadd.f32 %v690_v15, %v679_v18  ;;  %v650_v46 = vadd.f32 %v649_v12, %v638_v27  ;;  %v759_v30 = vadd.f32 %v758_v33, %v747_v1  ;;  %v709_v29 = vmul.f32 %v2181_v57, %v3251_v48  ;;  %v3253_v27 = vld [vmem:[#allocation4_spill] sm:$0xff]  ;;  %v3254_v15 = vld [vmem:[#allocation33_spill] sm:$0xff] }
  0x62   : > { %v569_v0 = vadd.f32 %v568_v34, %v557_v2  ;;  %v682_v53 = vmul.f32 %v2289_v43, %v1992_v11  ;;  %v641_v61 = vmul.f32 %v2254_v21, %v3252_v4  ;;  %v750_v16 = vmul.f32 %v2227_v49, %v3233_v23  ;;  %v3255_v34 = vld [vmem:[#allocation5_spill] sm:$0xff] }
  0x63   : > { %v692_v8 = vadd.f32 %v691_v52, %v680_v63  ;;  %v651_v6 = vadd.f32 %v650_v46, %v639_v47  ;;  %v760_v18 = vadd.f32 %v759_v30, %v748_v44  ;;  %v710_v1 = vmul.f32 %v2192_v20, %v3253_v27  ;;  %v2321_v44 = vld [vmem:[%s1560_s20 + $0x138] sm:$0xff]  ;;  %v2324_v30 = vld [vmem:[%s1560_s20 + $0x140] sm:$0xff] }
  0x64   : > { %570 = vadd.xlane.f32.xlu0 %v569_v0  ;;  %v683_v2 = vmul.f32 %v2300_v5, %v2028_v7  ;;  %v642_v12 = vmul.f32 %v2265_v42, %v3254_v15  ;;  %v751_v33 = vmul.f32 %v2238_v38, %v3234_v58  ;;  %v711_v23 = vmul.f32 %v2203_v39, %v3255_v34  ;;  %v3256_v0 = vld [vmem:[#allocation34_spill] sm:$0xff]  ;;  %v3257_v11 = vld [vmem:[#allocation37_spill] sm:$0xff]  ;;  %v3258_v15 = vld [vmem:[#allocation8_spill] sm:$0xff] }
  0x65   : > { %v693_v52 = vadd.f32 %v692_v8, %v681_v59  ;;  %v652_v46 = vadd.f32 %v651_v6, %v640_v32  ;;  %v761_v63 = vadd.f32 %v760_v18, %v749_v55  ;;  %v721_v47 = vadd.f32 %v709_v29, %v708_v60  ;;  %v2335_v8 = vld [vmem:[%s1560_s20 + $0x148] sm:$0xff]  ;;  %v3259_v18 = vld [vmem:[#allocation10_spill] sm:$0xff] }
  0x66   : > { %v643_v7 = vmul.f32 %v2268_v26, %v3256_v0  ;;  %v644_v14 = vmul.f32 %v2289_v43, %v3257_v11  ;;  %v752_v58 = vmul.f32 %v2243_v10, %v3236_v31  ;;  %v712_v59 = vmul.f32 %v2216_v9, %v3258_v15 }
  0x67   : > { %v694_v32 = vadd.f32 %v693_v52, %v682_v53  ;;  %v653_v55 = vadd.f32 %v652_v46, %v641_v61  ;;  %v762_v60 = vadd.f32 %v761_v63, %v750_v16  ;;  %v722_v29 = vadd.f32 %v721_v47, %v710_v1  ;;  %v2346_v1 = vld [vmem:[%s1560_s20 + $0x150] sm:$0xff]  ;;  %v3260_v52 = vld [vmem:[#allocation38_spill] sm:$0xff] }
  0x68   : > { %v753_v6 = vmul.f32 %v2254_v21, %v3239_v56  ;;  %v713_v34 = vmul.f32 %v2227_v49, %v3259_v18  ;;  %v833_v11 = vmul.f32 %v2321_v44, %v3237_v24  ;;  %v834_v31 = vmul.f32 %v2324_v30, %v3238_v3 }
  0x69   : > { %v695_v15 = vadd.f32 %v694_v32, %v683_v2  ;;  %v654_v53 = vadd.f32 %v653_v55, %v642_v12  ;;  %v763_v61 = vadd.f32 %v762_v60, %v751_v33  ;;  %v723_v16 = vadd.f32 %v722_v29, %v711_v23  ;;  %v2359_v23 = vld [vmem:[%s1560_s20 + $0x158] sm:$0xff]  ;;  %v2370_v32 = vld [vmem:[%s1560_s20 + $0x160] sm:$0xff]  ;;  %v3261_v60 = vld [vmem:[#allocation48_spill] sm:$0xff] }
  0x6a   : > { %v645_v46 = vmul.f32 %v2300_v5, %v3260_v52  ;;  %v754_v56 = vmul.f32 %v2265_v42, %v3240_v13  ;;  %v755_v63 = vmul.f32 %v2268_v26, %v3242_v25  ;;  %v835_v24 = vmul.f32 %v2335_v8, %v3241_v51  ;;  %v3262_v29 = vld [vmem:[#allocation49_spill] sm:$0xff] }
  0x6b   : > { %696 = vadd.xlane.f32.xlu1 %v695_v15  ;;  %v655_v3 = vadd.f32 %v654_v53, %v643_v7  ;;  %v764_v2 = vadd.f32 %v763_v61, %v752_v58  ;;  %v714_v12 = vmul.f32 %v2238_v38, %v3217_v40  ;;  %v724_v33 = vadd.f32 %v723_v16, %v712_v59  ;;  %v3264_v53 = vld [vmem:[#allocation15_spill] sm:$0xff] }
  0x6c   : > { %v756_v47 = vmul.f32 %v2289_v43, %v3243_v50  ;;  %v757_v13 = vmul.f32 %v2300_v5, %v3246_v36  ;;  %v836_v25 = vmul.f32 %v2346_v1, %v3244_v45  ;;  %v846_v51 = vadd.f32 %v834_v31, %v833_v11 }
  0x6d   : > { %v656_v7 = vadd.f32 %v655_v3, %v644_v14  ;;  %v765_v15 = vadd.f32 %v764_v2, %v753_v6  ;;  %v715_v58 = vmul.f32 %v2243_v10, %v3219_v41  ;;  %v725_v59 = vadd.f32 %v724_v33, %v713_v34  ;;  %v3263_v6 = vld [vmem:[#allocation14_spill] sm:$0xff]  ;;  %v2381_v34 = vld [vmem:[%s1560_s20 + $0x168] sm:$0xff]  ;;  %v2397_v33 = vld [vmem:[%s1560_s20 + $0x178] sm:$0xff] }
  0x6e   : > { %v837_v50 = vmul.f32 %v2359_v23, %v3245_v28  ;;  %v847_v55 = vadd.f32 %v846_v51, %v835_v24  ;;  %v782_v36 = vmul.f32 %v2178_v35, %v3261_v60  ;;  %v783_v45 = vmul.f32 %v2181_v57, %v3262_v29  ;;  %v2386_v28 = vld [vmem:[%s1560_s20 + $0x170] sm:$0xff] }
  0x6f   : > { %v657_v11 = vadd.f32 %v656_v7, %v645_v46  ;;  %v766_v14 = vadd.f32 %v765_v15, %v754_v56  ;;  %v716_v31 = vmul.f32 %v2254_v21, %v3263_v6  ;;  %v726_v41 = vadd.f32 %v725_v59, %v714_v12  ;;  %v3265_v24 = vld [vmem:[#allocation52_spill] sm:$0xff]  ;;  %v3269_v6 = vld [vmem:[#allocation57_spill] sm:$0xff] }
  0x70   : > { %v717_v61 = vmul.f32 %v2265_v42, %v3264_v53  ;;  %v838_v35 = vmul.f32 %v2370_v32, %v3247_v54  ;;  %v848_v16 = vadd.f32 %v847_v55, %v836_v25  ;;  %v784_v57 = vmul.f32 %v2192_v20, %v3265_v24  ;;  %v3266_v56 = vld [vmem:[#allocation16_spill] sm:$0xff] }
  0x71   : > { %658 = vadd.xlane.f32.xlu0 %v657_v11  ;;  %v767_v46 = vadd.f32 %v766_v14, %v755_v63  ;;  %v718_v3 = vmul.f32 %v2268_v26, %v3266_v56  ;;  %v719_v2 = vmul.f32 %v2289_v43, %v3227_v22  ;;  %v727_v12 = vadd.f32 %v726_v41, %v715_v58  ;;  %v3267_v59 = vld [vmem:[#allocation56_spill] sm:$0xff]  ;;  %v2408_v22 = vld [vmem:[%s1560_s20 + $0x180] sm:$0xff]  ;;  %v2411_v58 = vld [vmem:[%s1560_s20 + $0x188] sm:$0xff] }
  0x72   : > { %v839_v54 = vmul.f32 %v2381_v34, %v3248_v19  ;;  %v849_v25 = vadd.f32 %v848_v16, %v837_v50  ;;  %v785_v51 = vmul.f32 %v2203_v39, %v1980_v37  ;;  %v795_v20 = vadd.f32 %v783_v45, %v782_v36  ;;  %v3268_v50 = vld [vmem:[#allocation26_spill] sm:$0xff]  ;;  %v2432_v16 = vld [vmem:[%s1560_s20 + $0x190] sm:$0xff] }
  0x73   : > { %v768_v7 = vadd.f32 %v767_v46, %v756_v47  ;;  %v728_v15 = vadd.f32 %v727_v12, %v716_v31  ;;  %v840_v63 = vmul.f32 %v2386_v28, %v3249_v62  ;;  %v786_v55 = vmul.f32 %v2216_v9, %v3267_v59  ;;  %v3272_v46 = vld [vmem:[#allocation5_spill] sm:$0xff] }
  0x74   : > { %v850_v11 = vadd.f32 %v849_v25, %v838_v35  ;;  %v796_v14 = vadd.f32 %v795_v20, %v784_v57  ;;  %v908_v19 = vmul.f32 %v2321_v44, %v3250_v17  ;;  %v909_v39 = vmul.f32 %v2324_v30, %v3251_v48  ;;  %v3270_v48 = vld [vmem:[#allocation33_spill] sm:$0xff]  ;;  %v3271_v35 = vld [vmem:[#allocation59_spill] sm:$0xff]  ;;  %v3274_v25 = vld [vmem:[#allocation8_spill] sm:$0xff] }
  0x75   : > { %v769_v47 = vadd.f32 %v768_v7, %v757_v13  ;;  %v720_v62 = vmul.f32 %v2300_v5, %v3268_v50  ;;  %v729_v36 = vadd.f32 %v728_v15, %v717_v61  ;;  %v841_v9 = vmul.f32 %v2397_v33, %v3252_v4  ;;  %v3275_v20 = vld [vmem:[#allocation27_spill] sm:$0xff]  ;;  %v2443_v7 = vld [vmem:[%s1560_s20 + $0x198] sm:$0xff] }
  0x76   : > { %v851_v45 = vadd.f32 %v850_v11, %v839_v54  ;;  %v787_v31 = vmul.f32 %v2227_v49, %v3269_v6  ;;  %v797_v41 = vadd.f32 %v796_v14, %v785_v51  ;;  %v910_v17 = vmul.f32 %v2335_v8, %v3253_v27  ;;  %v3273_v54 = vld [vmem:[#allocation60_spill] sm:$0xff] }
  0x77   : > { %770 = vadd.xlane.f32.xlu1 %v769_v47  ;;  %v730_v53 = vadd.f32 %v729_v36, %v718_v3  ;;  %v842_v13 = vmul.f32 %v2408_v22, %v3270_v48  ;;  %v843_v61 = vmul.f32 %v2411_v58, %v3256_v0  ;;  %v788_v4 = vmul.f32 %v2238_v38, %v3271_v35 }
  0x78   : > { %v852_v57 = vadd.f32 %v851_v45, %v840_v63  ;;  %v798_v49 = vadd.f32 %v797_v41, %v786_v55  ;;  %v911_v56 = vmul.f32 %v2346_v1, %v3272_v46  ;;  %v921_v12 = vadd.f32 %v909_v39, %v908_v19  ;;  %v3276_v55 = vld [vmem:[#allocation28_spill] sm:$0xff]  ;;  %v3277_v19 = vld [vmem:[#allocation37_spill] sm:$0xff]  ;;  %v3282_v46 = vld [vmem:[#allocation63_spill] sm:$0xff] }
  0x79   : > { %v731_v27 = vadd.f32 %v730_v53, %v719_v2  ;;  %v789_v3 = vmul.f32 %v2243_v10, %v3273_v54  ;;  %v912_v51 = vmul.f32 %v2359_v23, %v3274_v25  ;;  %v871_v0 = vmul.f32 %v2321_v44, %v3275_v20  ;;  %v3278_v39 = vld [vmem:[#allocation61_spill] sm:$0xff]  ;;  %v3279_v53 = vld [vmem:[#allocation32_spill] sm:$0xff] }
  0x7a   : > { %v853_v38 = vadd.f32 %v852_v57, %v841_v9  ;;  %v799_v15 = vadd.f32 %v798_v49, %v787_v31  ;;  %v922_v63 = vadd.f32 %v921_v12, %v910_v17  ;;  %v872_v11 = vmul.f32 %v2324_v30, %v3276_v55  ;;  %v3283_v12 = vld [vmem:[#allocation64_spill] sm:$0xff] }
  0x7b   : > { %v732_v14 = vadd.f32 %v731_v27, %v720_v62  ;;  %v844_v2 = vmul.f32 %v2432_v16, %v3277_v19  ;;  %v790_v10 = vmul.f32 %v2254_v21, %v3278_v39  ;;  %v913_v47 = vmul.f32 %v2370_v32, %v3259_v18  ;;  %v3280_v62 = vld [vmem:[#allocation62_spill] sm:$0xff]  ;;  %v3281_v21 = vld [vmem:[#allocation36_spill] sm:$0xff] }
  0x7c   : > { %v854_v36 = vadd.f32 %v853_v38, %v842_v13  ;;  %v800_v45 = vadd.f32 %v799_v15, %v788_v4  ;;  %v923_v41 = vadd.f32 %v922_v63, %v911_v56  ;;  %v873_v9 = vmul.f32 %v2335_v8, %v3279_v53  ;;  %v3287_v53 = vld [vmem:[#allocation45_spill] sm:$0xff] }
  0x7d   : > { %733 = vadd.xlane.f32.xlu0 %v732_v14  ;;  %v845_v31 = vmul.f32 %v2443_v7, %v3260_v52  ;;  %v791_v17 = vmul.f32 %v2265_v42, %v3280_v62  ;;  %v914_v48 = vmul.f32 %v2381_v34, %v3217_v40  ;;  %v874_v57 = vmul.f32 %v2346_v1, %v3281_v21  ;;  %v2470_v42 = vld [vmem:[%s3020_s1 + $0x108] sm:$0xff]  ;;  %v3284_v52 = vld [vmem:[#allocation40_spill] sm:$0xff] }
  0x7e   : > { %v855_v18 = vadd.f32 %v854_v36, %v843_v61  ;;  %v801_v13 = vadd.f32 %v800_v45, %v789_v3  ;;  %v924_v4 = vadd.f32 %v923_v41, %v912_v51  ;;  %v884_v49 = vadd.f32 %v872_v11, %v871_v0  ;;  %v3285_v0 = vld [vmem:[#allocation42_spill] sm:$0xff] }
  0x7f   : > { %v792_v56 = vmul.f32 %v2268_v26, %v3282_v46  ;;  %v793_v27 = vmul.f32 %v2289_v43, %v3283_v12  ;;  %v915_v40 = vmul.f32 %v2470_v42, %v2386_v28  ;;  %v875_v61 = vmul.f32 %v2359_v23, %v3284_v52  ;;  %v2479_v26 = vld [vmem:[%s3020_s1 + $0x110] sm:$0xff] }
  0x80   : > { %v856_v3 = vadd.f32 %v855_v18, %v844_v2  ;;  %v802_v25 = vadd.f32 %v801_v13, %v790_v10  ;;  %v925_v51 = vadd.f32 %v924_v4, %v913_v47  ;;  %v885_v20 = vadd.f32 %v884_v49, %v873_v9  ;;  %v3286_v2 = vld [vmem:[#allocation65_spill] sm:$0xff]  ;;  %v3288_v4 = vld [vmem:[#allocation47_spill] sm:$0xff] }
  0x81   : > { %v916_v43 = vmul.f32 %v2479_v26, %v2397_v33  ;;  %v876_v38 = vmul.f32 %v2370_v32, %v3285_v0  ;;  %v982_v15 = vmul.f32 %v2321_v44, %v3261_v60  ;;  %v983_v63 = vmul.f32 %v2324_v30, %v3262_v29  ;;  %v2494_v47 = vld [vmem:[%s3020_s1 + $0x118] sm:$0xff]  ;;  %v2501_v60 = vld [vmem:[%s3020_s1 + $0x120] sm:$0xff] }
  0x82   : > { %v857_v55 = vadd.f32 %v856_v3, %v845_v31  ;;  %v803_v11 = vadd.f32 %v802_v25, %v791_v17  ;;  %v926_v14 = vadd.f32 %v925_v51, %v914_v48  ;;  %v886_v19 = vadd.f32 %v885_v20, %v874_v57  ;;  %v2512_v17 = vld [vmem:[%s3020_s1 + $0x128] sm:$0xff]  ;;  %v3289_v25 = vld [vmem:[#allocation50_spill] sm:$0xff] }
  0x83   : > { %v794_v10 = vmul.f32 %v2300_v5, %v3286_v2  ;;  %v917_v36 = vmul.f32 %v2494_v47, %v2408_v22  ;;  %v918_v29 = vmul.f32 %v2501_v60, %v2411_v58  ;;  %v984_v45 = vmul.f32 %v2335_v8, %v3265_v24 }
  0x84   : > { %858 = vadd.xlane.f32.xlu1 %v857_v55  ;;  %v804_v5 = vadd.f32 %v803_v11, %v792_v56  ;;  %v927_v41 = vadd.f32 %v926_v14, %v915_v40  ;;  %v877_v9 = vmul.f32 %v2381_v34, %v3287_v53  ;;  %v887_v31 = vadd.f32 %v886_v19, %v875_v61  ;;  %v2527_v61 = vld [vmem:[%s3020_s1 + $0x138] sm:$0xff]  ;;  %v3291_v55 = vld [vmem:[#allocation54_spill] sm:$0xff]  ;;  %v3292_v14 = vld [vmem:[#allocation55_spill] sm:$0xff] }
  0x85   : > { %v919_v48 = vmul.f32 %v2512_v17, %v2432_v16  ;;  %v920_v21 = vmul.f32 %v2443_v7, %v3268_v50  ;;  %v985_v24 = vmul.f32 %v2346_v1, %v1980_v37  ;;  %v995_v57 = vadd.f32 %v983_v63, %v982_v15  ;;  %v2534_v37 = vld [vmem:[%s3020_s1 + $0x140] sm:$0xff]  ;;  %v2547_v15 = vld [vmem:[%s3020_s1 + $0x148] sm:$0xff] }
  0x86   : > { %v805_v18 = vadd.f32 %v804_v5, %v793_v27  ;;  %v928_v13 = vadd.f32 %v927_v41, %v916_v43  ;;  %v878_v49 = vmul.f32 %v2386_v28, %v3288_v4  ;;  %v888_v56 = vadd.f32 %v887_v31, %v876_v38  ;;  %v3290_v43 = vld [vmem:[#allocation53_spill] sm:$0xff] }
  0x87   : > { %v986_v40 = vmul.f32 %v2359_v23, %v3267_v59  ;;  %v996_v52 = vadd.f32 %v995_v57, %v984_v45  ;;  %v945_v50 = vmul.f32 %v2527_v61, %v2321_v44  ;;  %v946_v27 = vmul.f32 %v2534_v37, %v2324_v30  ;;  %v2580_v57 = vld [vmem:[%s1560_s20 + $0x1b0] sm:$0xff] }
  0x88   : > { %v806_v59 = vadd.f32 %v805_v18, %v794_v10  ;;  %v929_v3 = vadd.f32 %v928_v13, %v917_v36  ;;  %v879_v51 = vmul.f32 %v2397_v33, %v3289_v25  ;;  %v889_v20 = vadd.f32 %v888_v56, %v877_v9  ;;  %v2559_v36 = vld [vmem:[%s1560_s20 + $0x1a8] sm:$0xff]  ;;  %v3293_v56 = vld [vmem:[#allocation58_spill] sm:$0xff] }
  0x89   : > { %v880_v0 = vmul.f32 %v2408_v22, %v3290_v43  ;;  %v987_v44 = vmul.f32 %v2370_v32, %v3269_v6  ;;  %v997_v38 = vadd.f32 %v996_v52, %v985_v24  ;;  %v947_v30 = vmul.f32 %v2547_v15, %v2335_v8  ;;  %v2556_v6 = vld [vmem:[%s1560_s20 + $0x1a0] sm:$0xff]  ;;  %v2566_v8 = vld [vmem:[%s3020_s1 + $0x150] sm:$0xff] }
  0x8a   : > { %807 = vadd.xlane.f32.xlu0 %v806_v59  ;;  %v930_v63 = vadd.f32 %v929_v3, %v918_v29  ;;  %v881_v11 = vmul.f32 %v2411_v58, %v3291_v55  ;;  %v882_v19 = vmul.f32 %v2432_v16, %v3292_v14  ;;  %v890_v10 = vadd.f32 %v889_v20, %v878_v49  ;;  %v2600_v59 = vld [vmem:[%s3020_s1 + $0x160] sm:$0xff] }
  0x8b   : > { %v988_v45 = vmul.f32 %v2381_v34, %v3271_v35  ;;  %v998_v5 = vadd.f32 %v997_v38, %v986_v40  ;;  %v948_v29 = vmul.f32 %v2566_v8, %v2346_v1  ;;  %v958_v41 = vadd.f32 %v946_v27, %v945_v50  ;;  %v2575_v35 = vld [vmem:[%s3020_s1 + $0x158] sm:$0xff]  ;;  %v2605_v25 = vld [vmem:[%s1560_s20 + $0x1c0] sm:$0xff] }
  0x8c   : > { %v931_v53 = vadd.f32 %v930_v63, %v919_v48  ;;  %v891_v9 = vadd.f32 %v890_v10, %v879_v51  ;;  %v989_v31 = vmul.f32 %v2386_v28, %v3273_v54  ;;  %v949_v24 = vmul.f32 %v2575_v35, %v2359_v23  ;;  %v1456_v48 = vld [vmem:[%s3020_s1 + $0x68] sm:$0xff]  ;;  %v1457_v54 = vld [vmem:[%s3020_s1 + $0x70] sm:$0xff]  ;;  %v2595_v50 = vld [vmem:[%s1560_s20 + $0x1b8] sm:$0xff] }
  0x8d   : > { %v999_v18 = vadd.f32 %v998_v5, %v987_v44  ;;  %v959_v1 = vadd.f32 %v958_v41, %v947_v30  ;;  %v1071_v13 = vmul.f32 %v1456_v48, %v2556_v6  ;;  %v1072_v4 = vmul.f32 %v1457_v54, %v2559_v36  ;;  %v1459_v51 = vld [vmem:[%s3020_s1 + $0x78] sm:$0xff]  ;;  %v2623_v63 = vld [vmem:[%s1560_s20 + $0x1c8] sm:$0xff]  ;;  %v1464_v41 = vld [vmem:[%s3020_s1] sm:$0xff] }
  0x8e   : > { %v932_v49 = vadd.f32 %v931_v53, %v920_v21  ;;  %v883_v23 = vmul.f32 %v2443_v7, %v3293_v56  ;;  %v892_v40 = vadd.f32 %v891_v9, %v880_v0  ;;  %v990_v52 = vmul.f32 %v2397_v33, %v3278_v39  ;;  %v1463_v5 = vld [vmem:[%s3020_s1 + $0x88] sm:$0xff] }
  0x8f   : > { %v1000_v27 = vadd.f32 %v999_v18, %v988_v45  ;;  %v950_v3 = vmul.f32 %v2600_v59, %v2370_v32  ;;  %v960_v21 = vadd.f32 %v959_v1, %v948_v29  ;;  %v1073_v39 = vmul.f32 %v1459_v51, %v2580_v57  ;;  %v2618_v32 = vld [vmem:[%s3020_s1 + $0x168] sm:$0xff]  ;;  %v2632_v45 = vld [vmem:[%s3020_s1 + $0x170] sm:$0xff] }
  0x90   : > { %933 = vadd.xlane.f32.xlu1 %v932_v49  ;;  %v893_v20 = vadd.f32 %v892_v40, %v881_v11  ;;  %v991_v43 = vmul.f32 %v2408_v22, %v3280_v62  ;;  %v992_v0 = vmul.f32 %v2411_v58, %v3282_v46  ;;  %v951_v44 = vmul.f32 %v2618_v32, %v2381_v34  ;;  %v1461_v62 = vld [vmem:[%s3020_s1 + $0x80] sm:$0xff] }
  0x91   : > { %v1001_v38 = vadd.f32 %v1000_v27, %v989_v31  ;;  %v961_v30 = vadd.f32 %v960_v21, %v949_v24  ;;  %v1074_v11 = vmul.f32 %v1461_v62, %v2595_v50  ;;  %v1084_v46 = vadd.f32 %v1072_v4, %v1071_v13  ;;  %v2645_v31 = vld [vmem:[%s1560_s20 + $0x1d0] sm:$0xff]  ;;  %v2656_v13 = vld [vmem:[%s3020_s1 + $0x178] sm:$0xff]  ;;  %v2676_v21 = vld [vmem:[%s3020_s1 + $0x180] sm:$0xff] }
  0x92   : > { %v894_v10 = vadd.f32 %v893_v20, %v882_v19  ;;  %v952_v34 = vmul.f32 %v2632_v45, %v2386_v28  ;;  %v1075_v29 = vmul.f32 %v1463_v5, %v2605_v25  ;;  %v1033_v19 = vmul.f32 %v1464_v41, %v2556_v6  ;;  %v1465_v28 = vld [vmem:[%s3020_s1 + $0x8] sm:$0xff]  ;;  %v1467_v4 = vld [vmem:[%s3020_s1 + $0x90] sm:$0xff] }
  0x93   : > { %v1002_v53 = vadd.f32 %v1001_v38, %v990_v52  ;;  %v962_v9 = vadd.f32 %v961_v30, %v950_v3  ;;  %v1085_v24 = vadd.f32 %v1084_v46, %v1073_v39  ;;  %v1034_v18 = vmul.f32 %v1465_v28, %v2559_v36  ;;  %v2665_v52 = vld [vmem:[%s1560_s20 + $0x1d8] sm:$0xff]  ;;  %v1468_v27 = vld [vmem:[%s3020_s1 + $0x10] sm:$0xff]  ;;  %v2689_v30 = vld [vmem:[%s1560_s20 + $0x1e0] sm:$0xff] }
  0x94   : > { %v895_v1 = vadd.f32 %v894_v10, %v883_v23  ;;  %v993_v48 = vmul.f32 %v2432_v16, %v3283_v12  ;;  %v953_v54 = vmul.f32 %v2656_v13, %v2397_v33  ;;  %v1076_v49 = vmul.f32 %v1467_v4, %v2623_v63  ;;  %v1470_v39 = vld [vmem:[%s3020_s1 + $0x98] sm:$0xff]  ;;  %v2701_v10 = vld [vmem:[%s3020_s1 + $0x190] sm:$0xff] }
  0x95   : > { %v1003_v40 = vadd.f32 %v1002_v53, %v991_v43  ;;  %v963_v23 = vadd.f32 %v962_v9, %v951_v44  ;;  %v1086_v12 = vadd.f32 %v1085_v24, %v1074_v11  ;;  %v1035_v3 = vmul.f32 %v1468_v27, %v2580_v57  ;;  %v1471_v43 = vld [vmem:[%s3020_s1 + $0x18] sm:$0xff]  ;;  %v2714_v53 = vld [vmem:[%s1560_s20 + $0x1e8] sm:$0xff] }
  0x96   : > { %896 = vadd.xlane.f32.xlu0 %v895_v1  ;;  %v994_v33 = vmul.f32 %v2443_v7, %v3286_v2  ;;  %v954_v51 = vmul.f32 %v2676_v21, %v2408_v22  ;;  %v1077_v20 = vmul.f32 %v1470_v39, %v2645_v31  ;;  %v1036_v2 = vmul.f32 %v1471_v43, %v2595_v50  ;;  %v2694_v22 = vld [vmem:[%s3020_s1 + $0x188] sm:$0xff]  ;;  %v1480_v43 = vld [vmem:[%s3020_s1 + $0x30] sm:$0xff] }
  0x97   : > { %v1004_v44 = vadd.f32 %v1003_v40, %v992_v0  ;;  %v964_v38 = vadd.f32 %v963_v23, %v952_v34  ;;  %v1087_v62 = vadd.f32 %v1086_v12, %v1075_v29  ;;  %v1046_v11 = vadd.f32 %v1034_v18, %v1033_v19  ;;  %v1474_v34 = vld [vmem:[%s3020_s1 + $0xa0] sm:$0xff]  ;;  %v1476_v24 = vld [vmem:[%s3020_s1 + $0xa8] sm:$0xff]  ;;  %v2729_v40 = vld [vmem:[%s1560_s20 + $0x1f0] sm:$0xff] }
  0x98   : > { %v955_v46 = vmul.f32 %v2694_v22, %v2411_v58  ;;  %v956_v0 = vmul.f32 %v2701_v10, %v2432_v16  ;;  %v1078_v5 = vmul.f32 %v1474_v34, %v2665_v52  ;;  %v1475_v29 = vld [vmem:[%s3020_s1 + $0x20] sm:$0xff]  ;;  %v1079_v28 = vmul.f32 %v1476_v24, %v2689_v30  ;;  %v1477_v18 = vld [vmem:[%s3020_s1 + $0x28] sm:$0xff]  ;;  %v2732_v23 = vld [vmem:[%s1560_s20 + $0x1f8] sm:$0xff] }
  0x99   : > { %v1037_v58 = vmul.f32 %v1475_v29, %v2605_v25  ;;  %v1005_v41 = vadd.f32 %v1004_v44, %v993_v48  ;;  %v965_v19 = vadd.f32 %v964_v38, %v953_v54  ;;  %v1088_v9 = vadd.f32 %v1087_v62, %v1076_v49  ;;  %v1484_v24 = vld [vmem:[%s3020_s1 + $0x40] sm:$0xff] }
  0x9a   : > { %v1047_v16 = vadd.f32 %v1046_v11, %v1035_v3  ;;  %v1038_v1 = vmul.f32 %v1477_v18, %v2623_v63  ;;  %v1145_v48 = vmul.f32 %v2527_v61, %v2556_v6  ;;  %v1146_v54 = vmul.f32 %v2534_v37, %v2559_v36  ;;  %v2737_v3 = vld [vmem:[%s3020_s1 + $0x198] sm:$0xff]  ;;  %v1479_v37 = vld [vmem:[%s3020_s1 + $0xb0] sm:$0xff] }
  0x9b   : > { %v1006_v4 = vadd.f32 %v1005_v41, %v994_v33  ;;  %v966_v49 = vadd.f32 %v965_v19, %v954_v51  ;;  %v1089_v12 = vadd.f32 %v1088_v9, %v1077_v20  ;;  %v957_v61 = vmul.f32 %v2737_v3, %v2443_v7 }
  0x9c   : > { %v1048_v27 = vadd.f32 %v1047_v16, %v1036_v2  ;;  %v1080_v33 = vmul.f32 %v1479_v37, %v2714_v53  ;;  %v1147_v51 = vmul.f32 %v2547_v15, %v2580_v57  ;;  %v1039_v2 = vmul.f32 %v1480_v43, %v2645_v31 }
  0x9d   : > { %1007 = vadd.xlane.f32.xlu1 %v1006_v4  ;;  %v967_v39 = vadd.f32 %v966_v49, %v955_v46  ;;  %v1090_v20 = vadd.f32 %v1089_v12, %v1078_v5  ;;  %v1081_v7 = vmul.f32 %v2729_v40, %v3291_v55  ;;  %v1082_v38 = vmul.f32 %v2732_v23, %v3292_v14  ;;  %v2758_v46 = vld [vmem:[%s1560_s20 + $0x200] sm:$0xff]  ;;  %v1481_v5 = vld [vmem:[%s3020_s1 + $0x38] sm:$0xff]  ;;  %v1482_v14 = vld [vmem:[%s3020_s1 + $0xd0] sm:$0xff] }
  0x9e   : > { %v1049_v44 = vadd.f32 %v1048_v27, %v1037_v58  ;;  %v1148_v62 = vmul.f32 %v2566_v8, %v2595_v50  ;;  %v1158_v15 = vadd.f32 %v1146_v54, %v1145_v48  ;;  %v1040_v29 = vmul.f32 %v1481_v5, %v2665_v52  ;;  %v1485_v54 = vld [vmem:[%s3020_s1 + $0xe0] sm:$0xff]  ;;  %v1486_v12 = vld [vmem:[%s3020_s1 + $0x48] sm:$0xff] }
  0x9f   : > { %v968_v11 = vadd.f32 %v967_v39, %v956_v0  ;;  %v1091_v34 = vadd.f32 %v1090_v20, %v1079_v28  ;;  %v1149_v55 = vmul.f32 %v2575_v35, %v2605_v25  ;;  %v1108_v8 = vmul.f32 %v1482_v14, %v2556_v6  ;;  %v1483_v0 = vld [vmem:[%s3020_s1 + $0xd8] sm:$0xff] }
  0xa0   : > { %v1050_v58 = vadd.f32 %v1049_v44, %v1038_v1  ;;  %v1159_v41 = vadd.f32 %v1158_v15, %v1147_v51  ;;  %v1109_v19 = vmul.f32 %v1483_v0, %v2559_v36  ;;  %v1041_v35 = vmul.f32 %v1484_v24, %v2689_v30  ;;  %v1488_v51 = vld [vmem:[%s3020_s1 + $0xe8] sm:$0xff] }
  0xa1   : > { %v969_v9 = vadd.f32 %v968_v11, %v957_v61  ;;  %v1092_v16 = vadd.f32 %v1091_v34, %v1080_v33  ;;  %v1083_v18 = vmul.f32 %v2758_v46, %v3293_v56  ;;  %v1150_v1 = vmul.f32 %v2600_v59, %v2623_v63  ;;  %v1487_v56 = vld [vmem:[%s3020_s1 + $0x50] sm:$0xff]  ;;  %v1490_v11 = vld [vmem:[%s3020_s1 + $0x1a0] sm:$0xff] }
  0xa2   : > { %v1051_v28 = vadd.f32 %v1050_v58, %v1039_v2  ;;  %v1160_v48 = vadd.f32 %v1159_v41, %v1148_v62  ;;  %v1110_v4 = vmul.f32 %v1485_v54, %v2580_v57  ;;  %v1042_v27 = vmul.f32 %v1486_v12, %v2714_v53 }
  0xa3   : > { %970 = vadd.xlane.f32.xlu0 %v969_v9  ;;  %v1093_v49 = vadd.f32 %v1092_v16, %v1081_v7  ;;  %v1043_v59 = vmul.f32 %v1487_v56, %v2729_v40  ;;  %v1151_v37 = vmul.f32 %v2618_v32, %v2645_v31  ;;  %v1111_v39 = vmul.f32 %v1488_v51, %v2595_v50  ;;  %v1489_v7 = vld [vmem:[%s3020_s1 + $0xf0] sm:$0xff]  ;;  %v1495_v9 = vld [vmem:[%s3020_s1 + $0x60] sm:$0xff] }
  0xa4   : > { %v1052_v61 = vadd.f32 %v1051_v28, %v1040_v29  ;;  %v1161_v33 = vadd.f32 %v1160_v48, %v1149_v55  ;;  %v1121_v20 = vadd.f32 %v1109_v19, %v1108_v8  ;;  %v1152_v44 = vmul.f32 %v2632_v45, %v2665_v52  ;;  %v1492_v29 = vld [vmem:[%s3020_s1 + $0x58] sm:$0xff]  ;;  %v1498_v56 = vld [vmem:[%s3020_s1 + $0x1c0] sm:$0xff] }
  0xa5   : > { %v1094_v43 = vadd.f32 %v1093_v49, %v1082_v38  ;;  %v1112_v62 = vmul.f32 %v1489_v7, %v2605_v25  ;;  %v1182_v34 = vmul.f32 %v1490_v11, %v2556_v6  ;;  %v1491_v38 = vld [vmem:[%s3020_s1 + $0x1a8] sm:$0xff]  ;;  %v1044_v58 = vmul.f32 %v1492_v29, %v2732_v23  ;;  %v1493_v6 = vld [vmem:[%s3020_s1 + $0xf8] sm:$0xff] }
  0xa6   : > { %v1053_v2 = vadd.f32 %v1052_v61, %v1041_v35  ;;  %v1162_v32 = vadd.f32 %v1161_v33, %v1150_v1  ;;  %v1122_v15 = vadd.f32 %v1121_v20, %v1110_v4  ;;  %v1183_v45 = vmul.f32 %v1491_v38, %v2559_v36  ;;  %v1494_v36 = vld [vmem:[%s3020_s1 + $0x1b0] sm:$0xff]  ;;  %v1496_v35 = vld [vmem:[%s3020_s1 + $0x100] sm:$0xff] }
  0xa7   : > { %v1095_v5 = vadd.f32 %v1094_v43, %v1083_v18  ;;  %v1153_v41 = vmul.f32 %v2656_v13, %v2689_v30  ;;  %v1113_v8 = vmul.f32 %v1493_v6, %v2623_v63  ;;  %v1184_v19 = vmul.f32 %v1494_v36, %v2580_v57  ;;  %v1497_v57 = vld [vmem:[%s3020_s1 + $0x1b8] sm:$0xff] }
  0xa8   : > { %v1054_v55 = vadd.f32 %v1053_v2, %v1042_v27  ;;  %v1163_v14 = vadd.f32 %v1162_v32, %v1151_v37  ;;  %v1123_v0 = vadd.f32 %v1122_v15, %v1111_v39  ;;  %v1045_v13 = vmul.f32 %v1495_v9, %v2758_v46 }
  0xa9   : > { %1096 = vadd.xlane.f32.xlu1 %v1095_v5  ;;  %v1154_v24 = vmul.f32 %v2676_v21, %v2714_v53  ;;  %v1114_v28 = vmul.f32 %v1496_v35, %v2645_v31  ;;  %v1185_v48 = vmul.f32 %v1497_v57, %v2595_v50  ;;  %v1195_v54 = vadd.f32 %v1183_v45, %v1182_v34  ;;  %v1503_v5 = vld [vmem:[%s3020_s1 + $0x130] sm:$0xff] }
  0xaa   : > { %v1055_v16 = vadd.f32 %v1054_v55, %v1043_v59  ;;  %v1164_v18 = vadd.f32 %v1163_v14, %v1152_v44  ;;  %v1124_v1 = vadd.f32 %v1123_v0, %v1112_v62  ;;  %v1155_v49 = vmul.f32 %v2694_v22, %v2729_v40  ;;  %v1506_v0 = vld [vmem:[%s3020_s1 + $0x1f8] sm:$0xff] }
  0xab   : > { %v1115_v21 = vmul.f32 %v2470_v42, %v2665_v52  ;;  %v1186_v59 = vmul.f32 %v1498_v56, %v2605_v25  ;;  %v1196_v61 = vadd.f32 %v1195_v54, %v1184_v19  ;;  %v1156_v50 = vmul.f32 %v2701_v10, %v2732_v23  ;;  %v1499_v42 = vld [vmem:[%s3020_s1 + $0x1c8] sm:$0xff] }
  0xac   : > { %v1056_v4 = vadd.f32 %v1055_v16, %v1044_v58  ;;  %v1165_v12 = vadd.f32 %v1164_v18, %v1153_v41  ;;  %v1125_v27 = vadd.f32 %v1124_v1, %v1113_v8  ;;  %v1116_v33 = vmul.f32 %v2479_v26, %v2689_v30  ;;  %v1500_v26 = vld [vmem:[%s3020_s1 + $0x1d0] sm:$0xff] }
  0xad   : > { %v1187_v39 = vmul.f32 %v1499_v42, %v2623_v63  ;;  %v1197_v20 = vadd.f32 %v1196_v61, %v1185_v48  ;;  %v1157_v25 = vmul.f32 %v2737_v3, %v2758_v46  ;;  %v1117_v43 = vmul.f32 %v2494_v47, %v2714_v53  ;;  %v1501_v3 = vld [vmem:[%s3020_s1 + $0x1d8] sm:$0xff] }
  0xae   : > { %v1057_v37 = vadd.f32 %v1056_v4, %v1045_v13  ;;  %v1166_v22 = vadd.f32 %v1165_v12, %v1154_v24  ;;  %v1126_v51 = vadd.f32 %v1125_v27, %v1114_v28  ;;  %v1188_v44 = vmul.f32 %v1500_v26, %v2645_v31  ;;  %v1502_v31 = vld [vmem:[%s3020_s1 + $0x1e0] sm:$0xff] }
  0xaf   : > { %v1198_v7 = vadd.f32 %v1197_v20, %v1186_v59  ;;  %v1118_v63 = vmul.f32 %v2501_v60, %v2729_v40  ;;  %v1189_v47 = vmul.f32 %v1501_v3, %v2665_v52  ;;  %v1119_v11 = vmul.f32 %v2512_v17, %v2732_v23  ;;  %v1504_v17 = vld [vmem:[%s3020_s1 + $0x1e8] sm:$0xff] }
  0xb0   : > { %1058 = vadd.xlane.f32.xlu0 %v1057_v37  ;;  %v1167_v10 = vadd.f32 %v1166_v22, %v1155_v49  ;;  %v1127_v2 = vadd.f32 %v1126_v51, %v1115_v21  ;;  %v1190_v60 = vmul.f32 %v1502_v31, %v2689_v30  ;;  %v1120_v52 = vmul.f32 %v1503_v5, %v2758_v46  ;;  %v1505_v30 = vld [vmem:[%s3020_s1 + $0x1f0] sm:$0xff] }
  0xb1   : > { %v1199_v15 = vadd.f32 %v1198_v7, %v1187_v39  ;;  %v1191_v58 = vmul.f32 %v1504_v17, %v2714_v53  ;;  %v1192_v14 = vmul.f32 %v1505_v30, %v2729_v40  ;;  %v1193_v36 = vmul.f32 %v1506_v0, %v2732_v23  ;;  %v1507_v53 = vld [vmem:[%s3020_s1 + $0x200] sm:$0xff] }
  0xb2   : > { %v1168_v62 = vadd.f32 %v1167_v10, %v1156_v50  ;;  %v1128_v32 = vadd.f32 %v1127_v2, %v1116_v33  ;;  %v1194_v9 = vmul.f32 %v1507_v53, %v2758_v46 }
  0xb3   : > { %v1200_v45 = vadd.f32 %v1199_v15, %v1188_v44 }
  0xb4   : > { %v1169_v34 = vadd.f32 %v1168_v62, %v1157_v25  ;;  %v1129_v38 = vadd.f32 %v1128_v32, %v1117_v43 }
  0xb5   : > { %v1201_v55 = vadd.f32 %v1200_v45, %v1189_v47 }
  0xb6   : > { %1170 = vadd.xlane.f32.xlu1 %v1169_v34  ;;  %v1130_v29 = vadd.f32 %v1129_v38, %v1118_v63 }
  0xb7   : > { %v1202_v6 = vadd.f32 %v1201_v55, %v1190_v60 }
  0xb8   : > { %v1131_v41 = vadd.f32 %v1130_v29, %v1119_v11 }
  0xb9   : > { %v1203_v19 = vadd.f32 %v1202_v6, %v1191_v58 }
  0xba   : > { %v1132_v8 = vadd.f32 %v1131_v41, %v1120_v52 }
  0xbb   : > { %v1204_v13 = vadd.f32 %v1203_v19, %v1192_v14  ;;  %v303_v24 = vpop.xlane.xlu1 %302 }
  0xbc   : > { %1133 = vadd.xlane.f32.xlu0 %v1132_v8  ;;  %v304_v18 = vrot.slane %v303_v24, 4 }
  0xbd   : > { %v1205_v16 = vadd.f32 %v1204_v13, %v1193_v36 }
  0xbe   : > { %v305_v54 = vadd.f32 %v304_v18, %v303_v24 }
  0xbf   : > { %v1206_v40 = vadd.f32 %v1205_v16, %v1194_v9 }
  0xc0   : > { %v198_v35 = vpop.xlane.xlu0 %197  ;;  %v306_v27 = vrot.slane %v305_v54, 2 }
  0xc1   : > { %1207 = vadd.xlane.f32.xlu0 %v1206_v40  ;;  %v199_v28 = vrot.slane %v198_v35, 4 }
  0xc2   : > { %v307_v50 = vadd.f32 %v306_v27, %v305_v54 }
  0xc3   : > { %v200_v1 = vadd.f32 %v199_v28, %v198_v35 }
  0xc4   : > { %v355_v57 = vpop.xlane.xlu1 %354  ;;  %v308_v20 = vrot.slane %v307_v50, 1 }
  0xc5   : > { %v201_v48 = vrot.slane %v200_v1, 2  ;;  %v356_v23 = vrot.slane %v355_v57, 4 }
  0xc6   : > { %v309_v44 = vadd.f32 %v308_v20, %v307_v50 }
  0xc7   : > { %v357_v4 = vadd.f32 %v356_v23, %v355_v57  ;;  %v202_v49 = vadd.f32 %v201_v48, %v200_v1 }
  0xc9   : > { %v358_v21 = vrot.slane %v357_v4, 2  ;;  %v203_v12 = vrot.slane %v202_v49, 1 }
  0xcb   : > { %v251_v56 = vpop.xlane.xlu0 %250  ;;  %v204_v59 = vadd.f32 %v203_v12, %v202_v49  ;;  %v359_v37 = vadd.f32 %v358_v21, %v357_v4 }
  0xcc   : > { %v252_v46 = vrot.slane %v251_v56, 4 }
  0xcd   : > { %1388 = vpush %v204_v59  ;;  %v360_v42 = vrot.slane %v359_v37, 1 }
  0xce   : > { %v253_v61 = vadd.f32 %v252_v46, %v251_v56 }
  0xcf   : > { %v361_v2 = vadd.f32 %v360_v42, %v359_v37 }
  0xd0   : > { %v254_v33 = vrot.slane %v253_v61, 2 }
  0xd2   : > { %v459_v22 = vpop.xlane.xlu1 %458  ;;  %v255_v51 = vadd.f32 %v254_v33, %v253_v61 }
  0xd3   : > { %v460_v39 = vrot.slane %v459_v22, 4 }
  0xd4   : > { %v256_v25 = vrot.slane %v255_v51, 1 }
  0xd5   : > { %v461_v43 = vadd.f32 %v460_v39, %v459_v22 }
  0xd6   : > { %v257_v10 = vadd.f32 %v256_v25, %v255_v51 }
  0xd7   : > { %v462_v26 = vrot.slane %v461_v43, 2 }
  0xd8   : > { %v407_v7 = vpop.xlane.xlu0 %406  ;;  %1390 = vpush %v257_v10 }
  0xd9   : > { %v408_v63 = vrot.slane %v407_v7, 4  ;;  %1392 = vpush %v309_v44  ;;  %v463_v62 = vadd.f32 %v462_v26, %v461_v43 }
  0xda   : > { %1394 = vpush %v361_v2 }
  0xdb   : > { %v409_v32 = vadd.f32 %v408_v63, %v407_v7  ;;  %v464_v47 = vrot.slane %v463_v62, 1 }
  0xdd   : > { %v410_v3 = vrot.slane %v409_v32, 2  ;;  %v465_v60 = vadd.f32 %v464_v47, %v463_v62 }
  0xdf   : > { %v534_v15 = vpop.xlane.xlu1 %533  ;;  %v411_v11 = vadd.f32 %v410_v3, %v409_v32 }
  0xe0   : > { %v535_v34 = vrot.slane %v534_v15, 4 }
  0xe1   : > { %v412_v38 = vrot.slane %v411_v11, 1 }
  0xe2   : > { %v536_v31 = vadd.f32 %v535_v34, %v534_v15 }
  0xe3   : > { %v413_v45 = vadd.f32 %v412_v38, %v411_v11 }
  0xe4   : > { %v537_v5 = vrot.slane %v536_v31, 2 }
  0xe5   : > { %v497_v52 = vpop.xlane.xlu0 %496  ;;  %1396 = vpush %v413_v45 }
  0xe6   : > { %v498_v29 = vrot.slane %v497_v52, 4  ;;  %1398 = vpush %v465_v60  ;;  %v538_v17 = vadd.f32 %v537_v5, %v536_v31 }
  0xe8   : > { %v499_v58 = vadd.f32 %v498_v29, %v497_v52  ;;  %v539_v30 = vrot.slane %v538_v17, 1 }
  0xea   : > { %v500_v55 = vrot.slane %v499_v58, 2  ;;  %v540_v36 = vadd.f32 %v539_v30, %v538_v17 }
  0xeb   : > { %v608_v41 = vpop.xlane.xlu1 %607 }
  0xec   : > { %v609_v14 = vrot.slane %v608_v41, 4  ;;  %v501_v6 = vadd.f32 %v500_v55, %v499_v58 }
  0xee   : > { %v610_v8 = vadd.f32 %v609_v14, %v608_v41  ;;  %v502_v0 = vrot.slane %v501_v6, 1 }
  0xf0   : > { %v611_v19 = vrot.slane %v610_v8, 2  ;;  %v503_v53 = vadd.f32 %v502_v0, %v501_v6 }
  0xf1   : > { %v571_v9 = vpop.xlane.xlu0 %570 }
  0xf2   : > { %v572_v13 = vrot.slane %v571_v9, 4  ;;  %1400 = vpush %v503_v53  ;;  %v612_v16 = vadd.f32 %v611_v19, %v610_v8 }
  0xf3   : > { %1402 = vpush %v540_v36 }
  0xf4   : > { %v573_v24 = vadd.f32 %v572_v13, %v571_v9  ;;  %v613_v35 = vrot.slane %v612_v16, 1 }
  0xf6   : > { %v574_v40 = vrot.slane %v573_v24, 2  ;;  %v614_v23 = vadd.f32 %v613_v35, %v612_v16 }
  0xf8   : > { %v697_v28 = vpop.xlane.xlu1 %696  ;;  %v575_v18 = vadd.f32 %v574_v40, %v573_v24 }
  0xf9   : > { %v698_v1 = vrot.slane %v697_v28, 4 }
  0xfa   : > { %v576_v57 = vrot.slane %v575_v18, 1 }
  0xfb   : > { %v699_v48 = vadd.f32 %v698_v1, %v697_v28 }
  0xfc   : > { %v577_v54 = vadd.f32 %v576_v57, %v575_v18 }
  0xfd   : > { %v700_v4 = vrot.slane %v699_v48, 2 }
  0xfe   : > { %v659_v49 = vpop.xlane.xlu0 %658  ;;  %1404 = vpush %v577_v54  ;;  %s1389_s16 = spop %1388 }
  0xff   : > { %v660_v21 = vrot.slane %v659_v49, 4  ;;  %1406 = vpush %v614_v23  ;;  %v701_v12 = vadd.f32 %v700_v4, %v699_v48 }
 0x101   : > { %v661_v27 = vadd.f32 %v660_v21, %v659_v49  ;;  %v702_v59 = vrot.slane %v701_v12, 1 }
 0x103   : > { %v662_v56 = vrot.slane %v661_v27, 2  ;;  %v703_v22 = vadd.f32 %v702_v59, %v701_v12 }
 0x104   : > { %v771_v46 = vpop.xlane.xlu1 %770 }
 0x105   : > { %v772_v61 = vrot.slane %v771_v46, 4  ;;  %v663_v37 = vadd.f32 %v662_v56, %v661_v27 }
 0x107   : > { %v773_v50 = vadd.f32 %v772_v61, %v771_v46  ;;  %v664_v33 = vrot.slane %v663_v37, 1 }
 0x109   : > { %v774_v51 = vrot.slane %v773_v50, 2  ;;  %v665_v42 = vadd.f32 %v664_v33, %v663_v37  ;;  %s1391_s17 = spop %1390 }
 0x10a   : > { %v734_v39 = vpop.xlane.xlu0 %733  ;;  %s1393_s20 = spop %1392 }
 0x10b   : > { %v735_v20 = vrot.slane %v734_v39, 4  ;;  %1408 = vpush %v665_v42  ;;  %v775_v25 = vadd.f32 %v774_v51, %v773_v50  ;;  %s1395_s18 = spop %1394 }
 0x10c   : > { %1410 = vpush %v703_v22 }
 0x10d   : > { %v736_v43 = vadd.f32 %v735_v20, %v734_v39  ;;  %v776_v2 = vrot.slane %v775_v25, 1 }
 0x10f   : > { %v737_v10 = vrot.slane %v736_v43, 2  ;;  %v777_v32 = vadd.f32 %v776_v2, %v775_v25 }
 0x111   : > { %v859_v26 = vpop.xlane.xlu1 %858  ;;  %v738_v44 = vadd.f32 %v737_v10, %v736_v43 }
 0x112   : > { %v860_v7 = vrot.slane %v859_v26, 4 }
 0x113   : > { %v739_v63 = vrot.slane %v738_v44, 1 }
 0x114   : > { %v861_v62 = vadd.f32 %v860_v7, %v859_v26 }
 0x115   : > { %v740_v3 = vadd.f32 %v739_v63, %v738_v44 }
 0x116   : > { %v862_v47 = vrot.slane %v861_v62, 2  ;;  %s1397_s19 = spop %1396 }
 0x117   : > { %v808_v15 = vpop.xlane.xlu0 %807  ;;  %1412 = vpush %v740_v3  ;;  %s1399_s21 = spop %1398 }
 0x118   : > { %v809_v11 = vrot.slane %v808_v15, 4  ;;  %1414 = vpush %v777_v32  ;;  %v863_v34 = vadd.f32 %v862_v47, %v861_v62  ;;  %v142_v47 = vlaneseq }
 0x11a   : > { %v810_v38 = vadd.f32 %v809_v11, %v808_v15  ;;  %v864_v45 = vrot.slane %v863_v34, 1 }
 0x11c   : > { %v811_v31 = vrot.slane %v810_v38, 2  ;;  %v865_v58 = vadd.f32 %v864_v45, %v863_v34  ;;  %v2900_v45 = vand.u32 127, %v142_v47 }
 0x11d   : > { %v934_v60 = vpop.xlane.xlu1 %933 }
 0x11e   : > { %v935_v5 = vrot.slane %v934_v60, 4  ;;  %v812_v52 = vadd.f32 %v811_v31, %v810_v38  ;;  %vm207_vm1 = vcmp.eq.s32.totalorder %v2900_v45, 0  ;;  %vm467_vm11 = vcmp.eq.s32.totalorder %v2900_v45, 1 }
 0x120   : > { %v936_v29 = vadd.f32 %v935_v5, %v934_v60  ;;  %v813_v17 = vrot.slane %v812_v52, 1  ;;  %v2898_v60 = vshrl.u32 %v142_v47, 7 }
 0x122   : > { %v937_v55 = vrot.slane %v936_v29, 2  ;;  %v814_v41 = vadd.f32 %v813_v17, %v812_v52  ;;  %vm206_vm0 = vcmp.eq.s32.totalorder %v2898_v60, 0  ;;  %vm259_vm2 = vcmp.eq.s32.totalorder %v2898_v60, 1 }
 0x123   : > { %v897_v30 = vpop.xlane.xlu0 %896  ;;  %vm208_vm3 = vmand %vm206_vm0, %vm207_vm1  ;;  %vm311_vm5 = vcmp.eq.s32.totalorder %v2898_v60, 2  ;;  %vm363_vm7 = vcmp.eq.s32.totalorder %v2898_v60, 3  ;;  %vm415_vm9 = vcmp.eq.s32.totalorder %v2898_v60, 4  ;;  %s1401_s22 = spop %1400 }
 0x124   : > { %v898_v14 = vrot.slane %v897_v30, 4  ;;  %1416 = vpush %v814_v41  ;;  %v938_v6 = vadd.f32 %v937_v55, %v936_v29  ;;  %v209_v55 = vstv %s1389_s16  ;;  %vm260_vm4 = vmand %vm259_vm2, %vm207_vm1  ;;  %v261_v41 = vstv %s1391_s17  ;;  %s1403_s23 = spop %1402  ;;  %s141_s17 = scalar_lea.vmem %s3021_s2, %s1280_s14 }
 0x125   : > { %1418 = vpush %v865_v58  ;;  %vm312_vm6 = vmand %vm311_vm5, %vm207_vm1 }
 0x126   : > { %v899_v8 = vadd.f32 %v898_v14, %v897_v30  ;;  %v939_v36 = vrot.slane %v938_v6, 1  ;;  %v210_v30 = vsel %vm208_vm3, %v209_v55, 0.0  ;;  %vm364_vm8 = vmand %vm363_vm7, %vm207_vm1 }
 0x127   : > { %v262_v14 = vsel %vm260_vm4, %v261_v41, %v210_v30  ;;  %vm416_vm10 = vmand %vm415_vm9, %vm207_vm1  ;;  %vm667_vm1 = vcmp.eq.s32.totalorder %v2900_v45, 2 }
 0x128   : > { %v900_v0 = vrot.slane %v899_v8, 2  ;;  %v940_v24 = vadd.f32 %v939_v36, %v938_v6  ;;  %v313_v6 = vstv %s1393_s20  ;;  %vm468_vm12 = vmand %vm206_vm0, %vm467_vm11 }
 0x129   : > { %vm505_vm13 = vmand %vm259_vm2, %vm467_vm11 }
 0x12a   : > { %v1008_v19 = vpop.xlane.xlu1 %1007  ;;  %v901_v53 = vadd.f32 %v900_v0, %v899_v8  ;;  %v314_v8 = vsel %vm312_vm6, %v313_v6, %v262_v14  ;;  %v365_v0 = vstv %s1395_s18  ;;  %vm542_vm14 = vmand %vm311_vm5, %vm467_vm11 }
 0x12b   : > { %v1009_v9 = vrot.slane %v1008_v19, 4  ;;  %v366_v36 = vsel %vm364_vm8, %v365_v0, %v314_v8  ;;  %vm579_vm15 = vmand %vm363_vm7, %vm467_vm11 }
 0x12c   : > { %v902_v13 = vrot.slane %v901_v53, 1  ;;  %vm616_vm3 = vmand %vm415_vm9, %vm467_vm11 }
 0x12d   : > { %v1010_v16 = vadd.f32 %v1009_v9, %v1008_v19  ;;  %v417_v19 = vstv %s1397_s19  ;;  %v469_v9 = vstv %s1399_s21  ;;  %vm668_vm4 = vmand %vm206_vm0, %vm667_vm1 }
 0x12e   : > { %v903_v40 = vadd.f32 %v902_v13, %v901_v53  ;;  %v418_v53 = vsel %vm416_vm10, %v417_v19, %v366_v36  ;;  %v506_v13 = vstv %s1401_s22  ;;  %vm705_vm6 = vmand %vm259_vm2, %vm667_vm1 }
 0x12f   : > { %v1011_v35 = vrot.slane %v1010_v16, 2  ;;  %s1405_s24 = spop %1404  ;;  %vm742_vm8 = vmand %vm311_vm5, %vm667_vm1 }
 0x130   : > { %v971_v28 = vpop.xlane.xlu0 %970  ;;  %1420 = vpush %v903_v40  ;;  %v543_v40 = vstv %s1403_s23  ;;  %s1407_s25 = spop %1406  ;;  %vm779_vm10 = vmand %vm363_vm7, %vm667_vm1 }
 0x131   : > { %v972_v18 = vrot.slane %v971_v28, 4  ;;  %1422 = vpush %v940_v24  ;;  %v1012_v1 = vadd.f32 %v1011_v35, %v1010_v16  ;;  %v470_v16 = vsel %vm468_vm12, %v469_v9, %v418_v53  ;;  %v580_v35 = vstv %s1405_s24  ;;  %vm816_vm11 = vmand %vm415_vm9, %vm667_vm1 }
 0x132   : > { %v507_v24 = vsel %vm505_vm13, %v506_v13, %v470_v16  ;;  %vm867_vm12 = vcmp.eq.s32.totalorder %v2900_v45, 3 }
 0x133   : > { %v973_v57 = vadd.f32 %v972_v18, %v971_v28  ;;  %v1013_v54 = vrot.slane %v1012_v1, 1  ;;  %v544_v28 = vsel %vm542_vm14, %v543_v40, %v507_v24  ;;  %vm868_vm13 = vmand %vm206_vm0, %vm867_vm12 }
 0x134   : > { %v581_v18 = vsel %vm579_vm15, %v580_v35, %v544_v28  ;;  %vm905_vm14 = vmand %vm259_vm2, %vm867_vm12 }
 0x135   : > { %v974_v48 = vrot.slane %v973_v57, 2  ;;  %v1014_v27 = vadd.f32 %v1013_v54, %v1012_v1  ;;  %v617_v1 = vstv %s1407_s25  ;;  %vm942_vm15 = vmand %vm311_vm5, %vm867_vm12 }
 0x136   : > { %v1097_v23 = vpop.xlane.xlu1 %1096  ;;  %vm979_vm1 = vmand %vm363_vm7, %vm867_vm12 }
 0x137   : > { %v1098_v4 = vrot.slane %v1097_v23, 4  ;;  %v975_v49 = vadd.f32 %v974_v48, %v973_v57  ;;  %v618_v48 = vsel %vm616_vm3, %v617_v1, %v581_v18  ;;  %vm1067_vm3 = vcmp.eq.s32.totalorder %v2900_v45, 4 }
 0x139   : > { %v1099_v21 = vadd.f32 %v1098_v4, %v1097_v23  ;;  %v976_v12 = vrot.slane %v975_v49, 1 }
 0x13b   : > { %v1100_v56 = vrot.slane %v1099_v21, 2  ;;  %v977_v46 = vadd.f32 %v976_v12, %v975_v49 }
 0x13c   : > { %s1409_s26 = spop %1408 }
 0x13d   : > { %v1059_v59 = vpop.xlane.xlu0 %1058  ;;  %1424 = vpush %v977_v46  ;;  %v1101_v37 = vadd.f32 %v1100_v56, %v1099_v21  ;;  %v669_v57 = vstv %s1409_s26  ;;  %s1411_s27 = spop %1410 }
 0x13e   : > { %v1060_v61 = vrot.slane %v1059_v59, 4  ;;  %1426 = vpush %v1014_v27  ;;  %v670_v23 = vsel %vm668_vm4, %v669_v57, %v618_v48  ;;  %v706_v54 = vstv %s1411_s27  ;;  %vm1016_vm4 = vmand %vm415_vm9, %vm867_vm12 }
 0x13f   : > { %v1102_v22 = vrot.slane %v1101_v37, 1  ;;  %v707_v49 = vsel %vm705_vm6, %v706_v54, %v670_v23  ;;  %vm1068_vm6 = vmand %vm206_vm0, %vm1067_vm3 }
 0x140   : > { %v1061_v50 = vadd.f32 %v1060_v61, %v1059_v59  ;;  %vm1179_vm0 = vmand %vm363_vm7, %vm1067_vm3 }
 0x141   : > { %v1103_v43 = vadd.f32 %v1102_v22, %v1101_v37 }
 0x142   : > { %v1062_v33 = vrot.slane %v1061_v50, 2 }
 0x143   : > { %v1171_v51 = vpop.xlane.xlu1 %1170 }
 0x144   : > { %v1063_v42 = vadd.f32 %v1062_v33, %v1061_v50  ;;  %v1172_v39 = vrot.slane %v1171_v51, 4 }
 0x146   : > { %v1064_v20 = vrot.slane %v1063_v42, 1  ;;  %v1173_v25 = vadd.f32 %v1172_v39, %v1171_v51 }
 0x148   : > { %v1065_v10 = vadd.f32 %v1064_v20, %v1063_v42  ;;  %v1174_v2 = vrot.slane %v1173_v25, 2  ;;  %s1413_s28 = spop %1412 }
 0x149   : > { %v1134_v26 = vpop.xlane.xlu0 %1133  ;;  %v743_v4 = vstv %s1413_s28  ;;  %s1415_s29 = spop %1414 }
 0x14a   : > { %1428 = vpush %v1065_v10  ;;  %v1135_v44 = vrot.slane %v1134_v26, 4  ;;  %v1175_v7 = vadd.f32 %v1174_v2, %v1173_v25  ;;  %v744_v21 = vsel %vm742_vm8, %v743_v4, %v707_v49  ;;  %v780_v12 = vstv %s1415_s29  ;;  %vm1105_vm8 = vmand %vm259_vm2, %vm1067_vm3 }
 0x14b   : > { %1430 = vpush %v1103_v43  ;;  %v781_v56 = vsel %vm779_vm10, %v780_v12, %v744_v21  ;;  %vm1142_vm10 = vmand %vm311_vm5, %vm1067_vm3  ;;  %vm1219_vm5 = vcmask 36864  }
 0x14c   : > { %v1136_v63 = vadd.f32 %v1135_v44, %v1134_v26  ;;  %v1176_v3 = vrot.slane %v1175_v7, 1  ;;  %vm1216_vm2 = vmand %vm415_vm9, %vm1067_vm3 }
 0x14e   : > { %v1137_v62 = vrot.slane %v1136_v63, 2  ;;  %v1208_v32 = vpop.xlane.xlu0 %1207  ;;  %v1177_v31 = vadd.f32 %v1176_v3, %v1175_v7 }
 0x14f   : > { %v1209_v15 = vrot.slane %v1208_v32, 4 }
 0x150   : > { %v1138_v11 = vadd.f32 %v1137_v62, %v1136_v63 }
 0x151   : > { %v1210_v34 = vadd.f32 %v1209_v15, %v1208_v32 }
 0x152   : > { %v1139_v38 = vrot.slane %v1138_v11, 1 }
 0x153   : > { %v1211_v5 = vrot.slane %v1210_v34, 2 }
 0x154   : > { %v1140_v52 = vadd.f32 %v1139_v38, %v1138_v11 }
 0x155   : > { %v1212_v29 = vadd.f32 %v1211_v5, %v1210_v34  ;;  %s1417_s30 = spop %1416 }
 0x156   : > { %1432 = vpush %v1140_v52  ;;  %v817_v27 = vstv %s1417_s30  ;;  %s1419_s3 = spop %1418 }
 0x157   : > { %1434 = vpush %v1177_v31  ;;  %v1213_v17 = vrot.slane %v1212_v29, 1  ;;  %v818_v46 = vsel %vm816_vm11, %v817_v27, %v781_v56  ;;  %v869_v59 = vstv %s1419_s3 }
 0x158   : > { %v870_v37 = vsel %vm868_vm13, %v869_v59, %v818_v46 }
 0x159   : > { %v1214_v58 = vadd.f32 %v1213_v17, %v1212_v29 }
 0x15b   : > { %1436 = vpush %v1214_v58 }
 0x161   : > { %s1421_s4 = spop %1420 }
 0x162   : > { %v906_v61 = vstv %s1421_s4  ;;  %s1423_s5 = spop %1422 }
 0x163   : > { %v907_v50 = vsel %vm905_vm14, %v906_v61, %v870_v37  ;;  %v943_v33 = vstv %s1423_s5 }
 0x164   : > { %v944_v51 = vsel %vm942_vm15, %v943_v33, %v907_v50 }
 0x16e   : > { %s1425_s6 = spop %1424 }
 0x16f   : > { %v980_v22 = vstv %s1425_s6  ;;  %s1427_s7 = spop %1426 }
 0x170   : > { %v981_v42 = vsel %vm979_vm1, %v980_v22, %v944_v51  ;;  %v1017_v39 = vstv %s1427_s7 }
 0x171   : > { %v1018_v25 = vsel %vm1016_vm4, %v1017_v39, %v981_v42 }
 0x17b   : > { %s1429_s8 = spop %1428 }
 0x17c   : > { %v1069_v20 = vstv %s1429_s8  ;;  %s1431_s11 = spop %1430 }
 0x17d   : > { %v1070_v43 = vsel %vm1068_vm6, %v1069_v20, %v1018_v25  ;;  %v1106_v10 = vstv %s1431_s11 }
 0x17e   : > { %v1107_v26 = vsel %vm1105_vm8, %v1106_v10, %v1070_v43 }
 0x187   : > { %s1433_s12 = spop %1432 }
 0x188   : > { %v1143_v2 = vstv %s1433_s12  ;;  %s1435_s13 = spop %1434 }
 0x189   : > { %v1144_v44 = vsel %vm1142_vm10, %v1143_v2, %v1107_v26  ;;  %v1180_v7 = vstv %s1435_s13 }
 0x18a   : > { %v1181_v63 = vsel %vm1179_vm0, %v1180_v7, %v1144_v44 }
 0x18c   : > { %s1437_s20 = spop %1436 }
 0x18d   : > { %v1217_v62 = vstv %s1437_s20 }
 0x18e   : > { %v1218_v32 = vsel %vm1216_vm2, %v1217_v62, %v1181_v63 }
 0x18f   : > { %1220 = vst.msk [vmem:[%s141_s17] sm:$0x1f] %vm1219_vm5, %v1218_v32 }
 0x190 PF: > { %s12_s9 = sadd.s32 1, %s1514_s9  }
 0x191   : > { %p9_p4 = scmp.ge.s32.totalorder %s12_s9, 4  }
 0x193   :  { %11 = sbr.rel (!%p9_p4) target bundleno = 1 (0x1), region = 66 }

</bundles_post_ra>
